<compile_context>
chip_gen: v6e
topology: v6e:2x2x1
jax: 0.10.0
libtpu: 0.0.40
codegen_flags: <defaults>
</compile_context>

<pallas_src>
import jax
import jax.numpy as jnp
from jax.experimental import pallas as pl
from jax.experimental.pallas import tpu as pltpu

LEAKY_SLOPE = 0.01   # nn.LeakyReLU() default
BN_EPS = 1e-5        # nn.BatchNorm1d default
K_MAX = 5            # largest branch kernel size
COUT = 96            # 3 * 32 concat channels per block
C_PAD = 128          # lane-width padded channel count
NB_CAP = 32          # max batch rows per grid step (keeps VMEM/spill modest)


# --------------------------------------------------------------------------
# Pallas kernel (whole network, fused)
# --------------------------------------------------------------------------
def _inception5(src, w_ref, b_ref, L):
    """Fused 1/3/5-branch Inception conv for one block.

    src  : (nb, L+4, Cp) bf16 value, zero-padded by 2 on each side of L.
    w_ref: (5, Cp, 128)  bf16, branches packed along Cout, taps centred.
    b_ref: (1, 128)      f32 folded bias (zeros in the 96..127 pad lanes).
    returns (nb, L, 128) f32 activations after LeakyReLU.
    """
    nb, _, cp = src.shape
    co = w_ref.shape[-1]
    # tap 0 initializes the accumulator together with the bias (no zeros fill)
    x0 = src[:, 0:L, :].reshape(nb * L, cp)
    acc = jnp.dot(x0, w_ref[0], preferred_element_type=jnp.float32) + b_ref[...]
    for k in range(1, K_MAX):                      # static unrolled taps
        xk = src[:, k:k + L, :].reshape(nb * L, cp)
        acc = acc + jnp.dot(xk, w_ref[k], preferred_element_type=jnp.float32)
    acc = jnp.where(acc >= 0, acc, LEAKY_SLOPE * acc)   # LeakyReLU (f32)
    return acc.reshape(nb, L, co)


def inception_time_kernel(x_ref, w1_ref, b1_ref, w2_ref, b2_ref, w3_ref, b3_ref,
                          fcw_ref, fcb_ref, out_ref, act_ref):
    """One batch tile: 3 Inception blocks + mean-pool over L + Linear.

    x_ref  : (nb, L+4, Cp1) bf16, input tile (L-halo + channel padded).
    wK_ref : (5, Cp, 128) bf16 fused block weights;  bK_ref: (1, 128) f32.
    fcw_ref: (128, num_classes) f32 (rows 96..127 zero);  fcb_ref: (1, nc) f32.
    out_ref: (nb, num_classes) f32.
    act_ref: (nb, L+4, 128) bf16 VMEM scratch reused for both intermediates.
    """
    nb, lp, _ = x_ref.shape
    L = lp - 4
    cpad = act_ref.shape[-1]

    # Zero the L-halo rows of the VMEM-resident intermediate.  Scratch
    # persists across grid steps and may start uninitialised; with megacore
    # grid sharding the "first" step differs per core, so zero every step
    # (2 stores of 2 sublane rows each -> negligible).
    halo = jnp.zeros((nb, 2, cpad), act_ref.dtype)
    act_ref[:, 0:2, :] = halo
    act_ref[:, L + 2:L + 4, :] = halo

    # Block 1 (input already halo/channel padded by the wrapper).
    y1 = _inception5(x_ref[...], w1_ref, b1_ref, L)
    act_ref[:, 2:L + 2, :] = y1.astype(act_ref.dtype)

    # Block 2 (reads the scratch value, then overwrites the same buffer).
    y2 = _inception5(act_ref[...], w2_ref, b2_ref, L)
    act_ref[:, 2:L + 2, :] = y2.astype(act_ref.dtype)

    # Block 3 + AdaptiveAvgPool1d(1) + Linear fused into the epilogue:
    # the (nb, L, 128) activation never leaves VMEM/vregs.
    y3 = _inception5(act_ref[...], w3_ref, b3_ref, L)
    pooled = jnp.mean(y3, axis=1)                                  # (nb, 128)
    out_ref[...] = (jnp.dot(pooled, fcw_ref[...],
                            preferred_element_type=jnp.float32)
                    + fcb_ref[...])


# --------------------------------------------------------------------------
# Wrapper (glue: layout, padding, grid/BlockSpecs)
# --------------------------------------------------------------------------
def _pick_batch_tile(n):
    """Largest legal batch tile: whole batch if small, else a multiple-of-8
    divisor of N (output-sublane rule: block dim must be mult-of-8 or full)."""
    if n <= NB_CAP:
        return n
    for nb in range(NB_CAP, 7, -8):
        if n % nb == 0:
            return nb
    return n                                   # fallback: single grid step


def inception_time_forward(x_ncl, kparams):
    """x_ncl: PyTorch-layout input (N, C, L).  (x.view(N,-1,L) is identity.)"""
    N, C, L = x_ncl.shape
    cin_pad = kparams["cin_pad"]
    nc = kparams["fc_w"].shape[1]

    # NCL -> NLC, pad L by 2 on each side (halo for the 5-tap fused conv) and
    # pad Cin to a sublane-aligned width; bf16 for the MXU.
    x = jnp.transpose(x_ncl, (0, 2, 1)).astype(jnp.float32)
    xp = jnp.pad(x, ((0, 0), (2, 2), (0, cin_pad - C))).astype(jnp.bfloat16)

    nb = _pick_batch_tile(N)
    grid = (pl.cdiv(N, nb),)

    (w1, b1), (w2, b2), (w3, b3) = kparams["blocks"]

    x_spec = pl.BlockSpec((nb, L + 4, cin_pad), lambda i: (i, 0, 0))
    w_spec = lambda w: pl.BlockSpec(w.shape, lambda i: (0, 0, 0))  # resident
    v_spec = lambda v: pl.BlockSpec(v.shape, lambda i: (0, 0))     # resident

    grid_spec = pltpu.PrefetchScalarGridSpec(
        num_scalar_prefetch=0,
        grid=grid,
        in_specs=[x_spec,
                  w_spec(w1), v_spec(b1),
                  w_spec(w2), v_spec(b2),
                  w_spec(w3), v_spec(b3),
                  v_spec(kparams["fc_w"]), v_spec(kparams["fc_b"])],
        out_specs=pl.BlockSpec((nb, nc), lambda i: (i, 0)),
        scratch_shapes=[pltpu.VMEM((nb, L + 4, C_PAD), jnp.bfloat16)],
    )

    return pl.pallas_call(
        inception_time_kernel,
        out_shape=jax.ShapeDtypeStruct((N, nc), jnp.float32),
        grid_spec=grid_spec,
        compiler_params=pltpu.CompilerParams(
            dimension_semantics=("parallel",),        # v7x: shard N over 2 TCs
            vmem_limit_bytes=32 * 1024 * 1024,        # safe on v5e/v6e/v7x
        ),
    )(xp, w1, b1, w2, b2, w3, b3, kparams["fc_w"], kparams["fc_b"])


# --------------------------------------------------------------------------
# Parameter preparation (BN folding + branch fusion + padding)
# --------------------------------------------------------------------------
def fold_bn(w_torch, b_conv, gamma, beta, mean, var):
    """Fold inference-mode BatchNorm1d into the conv weight/bias.

    w_torch: (Cout, Cin, K) torch layout -> returns (K, Cin, Cout), (1, Cout).
    """
    s = gamma / jnp.sqrt(var + BN_EPS)                 # (Cout,)
    w = jnp.transpose(w_torch, (2, 1, 0)) * s          # (K, Cin, Cout)
    b = ((b_conv - mean) * s + beta).reshape(1, -1)    # (1, Cout)
    return w.astype(jnp.float32), b.astype(jnp.float32)


def _fuse_block(branches, cin, cin_pad):
    """Pack the K=1/3/5 branch weights into one centred 5-tap, 128-wide conv."""
    w_f = jnp.zeros((K_MAX, cin_pad, C_PAD), jnp.float32)
    b_f = jnp.zeros((1, C_PAD), jnp.float32)
    for j, (w, b) in enumerate(branches):              # order: K = 1, 3, 5
        K = w.shape[0]
        t0 = (K_MAX - K) // 2                          # centre the taps
        c0 = j * 32
        w_f = w_f.at[t0:t0 + K, :cin, c0:c0 + 32].set(w)
        b_f = b_f.at[:, c0:c0 + 32].set(b)
    return w_f.astype(jnp.bfloat16), b_f               # bias stays f32


def prepare_kernel_params(ref_params, in_channels):
    """Fused / padded / bf16 parameters consumed by the Pallas kernel."""
    cin_pad1 = max(8, ((in_channels + 7) // 8) * 8)
    blocks, cin, cpad = [], in_channels, cin_pad1
    for branches in ref_params["blocks"]:
        blocks.append(_fuse_block(branches, cin, cpad))
        cin, cpad = COUT, C_PAD
    fc_w = jnp.zeros((C_PAD, ref_params["fc_w"].shape[1]), jnp.float32)
    fc_w = fc_w.at[:COUT, :].set(ref_params["fc_w"])
    return {"blocks": blocks, "fc_w": fc_w, "fc_b": ref_params["fc_b"],
            "cin_pad": cin_pad1}


def init_reference_params(key, in_channels, num_classes):
    """Deterministic synthetic parameters matching the PyTorch module shapes
    (per-branch, BN-folded, f32 — the 'true' math used by the reference)."""
    blocks = []
    cin = in_channels
    for _ in range(3):
        block = []
        for k in (1, 3, 5):
            key, k1, k2, k3, k4, k5, k6 = jax.random.split(key, 7)
            w = jax.random.normal(k1, (32, cin, k), jnp.float32) * 0.1
            b = jax.random.normal(k2, (32,), jnp.float32) * 0.05
            gamma = 1.0 + 0.1 * jax.random.normal(k3, (32,), jnp.float32)
            beta = 0.05 * jax.random.normal(k4, (32,), jnp.float32)
            mean = 0.05 * jax.random.normal(k5, (32,), jnp.float32)
            var = 1.0 + 0.1 * jnp.abs(jax.random.normal(k6, (32,), jnp.float32))
            block.append(fold_bn(w, b, gamma, beta, mean, var))
        blocks.append(block)
        cin = COUT
    key, kw, kb = jax.random.split(key, 3)
    fc_w = jax.random.normal(kw, (COUT, num_classes), jnp.float32) * 0.1
    fc_b = (0.05 * jax.random.normal(kb, (num_classes,), jnp.float32)).reshape(1, -1)
    return {"blocks": blocks, "fc_w": fc_w, "fc_b": fc_b}


# --------------------------------------------------------------------------
# Pure-JAX f32 reference (PyTorch inference semantics) for the sanity check
# --------------------------------------------------------------------------
def _ref_forward(x_ncl, ref_params):
    x = jnp.transpose(x_ncl, (0, 2, 1)).astype(jnp.float32)
    for block in ref_params["blocks"]:
        L = x.shape[1]
        outs = []
        for (w, b) in block:                       # w: (K, Cin, 32), b: (1, 32)
            K = w.shape[0]
            pad = (K - 1) // 2
            xp = jnp.pad(x, ((0, 0), (pad, pad), (0, 0)))
            acc = sum(jnp.einsum("nlc,cd->nld", xp[:, k:k + L, :], w[k])
                      for k in range(K)) + b
            outs.append(jnp.where(acc >= 0, acc, LEAKY_SLOPE * acc))
        x = jnp.concatenate(outs, axis=-1)
    pooled = jnp.mean(x, axis=1)
    return pooled @ ref_params["fc_w"] + ref_params["fc_b"]


# --------------------------------------------------------------------------
if __name__ == "__main__":
    key = jax.random.PRNGKey(0)
    key, kx, kp = jax.random.split(key, 3)

    C, L, num_classes = 4, 16, 5            # input_shape = (4, 16), 5 classes
    ref_params = init_reference_params(kp, in_channels=C, num_classes=num_classes)
    kparams = prepare_kernel_params(ref_params, in_channels=C)

    # Two batch sizes: N=2 (tiny full-batch tile) and N=16 (single 16-row tile)
    # to exercise the BlockSpec index_maps and the batch-tile selection.
    for N in (2, 16):
        kx, kxi = jax.random.split(kx)
        x = jax.random.normal(kxi, (N, C, L), jnp.float32)   # PyTorch NCL layout

        out = jax.block_until_ready(inception_time_forward(x, kparams))
        assert out.shape == (N, num_classes)

        ref = jax.block_until_ready(_ref_forward(x, ref_params))
        # Kernel feeds the MXU with bf16 weights/activations (f32 accumulation),
        # so allow bf16-level deviation from the all-f32 reference.
        err = jnp.max(jnp.abs(out - ref))
        assert jnp.allclose(out, ref, atol=2e-2, rtol=2e-2), (
            f"N={N}: max abs diff {err}")

    print("KERNEL_OK")
</pallas_src>

<mosaic_0001>
module attributes {stable_mosaic.version = 11 : i64} {
  func.func @inception_time_kernel(%arg0: i32, %arg1: memref<2x20x8xbf16, #tpu.memory_space<vmem>>, %arg2: memref<5x8x128xbf16, #tpu.memory_space<vmem>>, %arg3: memref<1x128xf32, #tpu.memory_space<vmem>>, %arg4: memref<5x128x128xbf16, #tpu.memory_space<vmem>>, %arg5: memref<1x128xf32, #tpu.memory_space<vmem>>, %arg6: memref<5x128x128xbf16, #tpu.memory_space<vmem>>, %arg7: memref<1x128xf32, #tpu.memory_space<vmem>>, %arg8: memref<128x5xf32, #tpu.memory_space<vmem>>, %arg9: memref<1x5xf32, #tpu.memory_space<vmem>>, %arg10: memref<2x5xf32, #tpu.memory_space<vmem>>, %arg11: memref<2x20x128xbf16, #tpu.memory_space<vmem>>) attributes {dimension_semantics = [#tpu.dimension_semantics<parallel>], iteration_bounds = array<i64: 1>, scalar_prefetch = 0 : i64, scratch_operands = 1 : i64, tpu.core_type = #tpu.core_type<tc>, window_params = [{transform_indices = @transform_0, window_bounds = array<i64: 2, 20, 8>}, {pipeline_mode = #tpu.pipeline_mode<synchronous>, transform_indices = @transform_1, window_bounds = array<i64: 5, 8, 128>}, {pipeline_mode = #tpu.pipeline_mode<synchronous>, transform_indices = @transform_2, window_bounds = array<i64: 1, 128>}, {pipeline_mode = #tpu.pipeline_mode<synchronous>, transform_indices = @transform_3, window_bounds = array<i64: 5, 128, 128>}, {pipeline_mode = #tpu.pipeline_mode<synchronous>, transform_indices = @transform_4, window_bounds = array<i64: 1, 128>}, {pipeline_mode = #tpu.pipeline_mode<synchronous>, transform_indices = @transform_5, window_bounds = array<i64: 5, 128, 128>}, {pipeline_mode = #tpu.pipeline_mode<synchronous>, transform_indices = @transform_6, window_bounds = array<i64: 1, 128>}, {pipeline_mode = #tpu.pipeline_mode<synchronous>, transform_indices = @transform_7, window_bounds = array<i64: 128, 5>}, {pipeline_mode = #tpu.pipeline_mode<synchronous>, transform_indices = @transform_8, window_bounds = array<i64: 1, 5>}, {transform_indices = @transform_9, window_bounds = array<i64: 2, 5>}]} {
    %cst = arith.constant 0.000000e+00 : bf16
    %0 = vector.broadcast %cst : bf16 to vector<2x2x128xbf16>
    %c0 = arith.constant 0 : index
    %c0_0 = arith.constant 0 : index
    %c0_1 = arith.constant 0 : index
    %1 = vector.load %arg11[%c0, %c0_0, %c0_1] : memref<2x20x128xbf16, #tpu.memory_space<vmem>>, vector<2x2x128xbf16>
    tpu.vector_store %arg11[%c0, %c0_0, %c0_1], %0 {strides = array<i32>} : memref<2x20x128xbf16, #tpu.memory_space<vmem>>, vector<2x2x128xbf16>,
    %c0_2 = arith.constant 0 : index
    %c18 = arith.constant 18 : index
    %c0_3 = arith.constant 0 : index
    %2 = vector.load %arg11[%c0_2, %c18, %c0_3] : memref<2x20x128xbf16, #tpu.memory_space<vmem>>, vector<2x2x128xbf16>
    tpu.vector_store %arg11[%c0_2, %c18, %c0_3], %0 {strides = array<i32>} : memref<2x20x128xbf16, #tpu.memory_space<vmem>>, vector<2x2x128xbf16>,
    %c0_4 = arith.constant 0 : index
    %c0_5 = arith.constant 0 : index
    %c0_6 = arith.constant 0 : index
    %3 = vector.load %arg1[%c0_4, %c0_5, %c0_6] : memref<2x20x8xbf16, #tpu.memory_space<vmem>>, vector<2x20x8xbf16>
    %4 = vector.extract_strided_slice %3 {offsets = [0, 0, 0], sizes = [2, 16, 8], strides = [1, 1, 1]} : vector<2x20x8xbf16> to vector<2x16x8xbf16>
    %5 = vector.shape_cast %4 : vector<2x16x8xbf16> to vector<32x8xbf16>
    %c0_7 = arith.constant 0 : index
    %c0_8 = arith.constant 0 : index
    %c0_9 = arith.constant 0 : index
    %6 = vector.load %arg2[%c0_7, %c0_8, %c0_9] : memref<5x8x128xbf16, #tpu.memory_space<vmem>>, vector<1x8x128xbf16>
    %7 = vector.shape_cast %6 : vector<1x8x128xbf16> to vector<8x128xbf16>
    %cst_10 = arith.constant dense<0.000000e+00> : vector<32x128xf32>
    %8 = tpu.matmul %5, %7, %cst_10 {dimension_numbers = #tpu.dot_dimension_numbers<[1], [0], [0], [1], [0, 0, 1, 1], [], []>} : vector<32x8xbf16>, vector<8x128xbf16>, vector<32x128xf32> -> vector<32x128xf32>
    %c0_11 = arith.constant 0 : index
    %c0_12 = arith.constant 0 : index
    %9 = vector.load %arg3[%c0_11, %c0_12] : memref<1x128xf32, #tpu.memory_space<vmem>>, vector<1x128xf32>
    %10 = vector.broadcast %9 : vector<1x128xf32> to vector<32x128xf32>
    %11 = arith.addf %8, %10 : vector<32x128xf32>
    %12 = vector.extract_strided_slice %3 {offsets = [0, 1, 0], sizes = [2, 16, 8], strides = [1, 1, 1]} : vector<2x20x8xbf16> to vector<2x16x8xbf16>
    %13 = vector.shape_cast %12 : vector<2x16x8xbf16> to vector<32x8xbf16>
    %c1 = arith.constant 1 : index
    %c0_13 = arith.constant 0 : index
    %c0_14 = arith.constant 0 : index
    %14 = vector.load %arg2[%c1, %c0_13, %c0_14] : memref<5x8x128xbf16, #tpu.memory_space<vmem>>, vector<1x8x128xbf16>
    %15 = vector.shape_cast %14 : vector<1x8x128xbf16> to vector<8x128xbf16>
    %cst_15 = arith.constant dense<0.000000e+00> : vector<32x128xf32>
    %16 = tpu.matmul %13, %15, %cst_15 {dimension_numbers = #tpu.dot_dimension_numbers<[1], [0], [0], [1], [0, 0, 1, 1], [], []>} : vector<32x8xbf16>, vector<8x128xbf16>, vector<32x128xf32> -> vector<32x128xf32>
    %17 = arith.addf %11, %16 : vector<32x128xf32>
    %18 = vector.extract_strided_slice %3 {offsets = [0, 2, 0], sizes = [2, 16, 8], strides = [1, 1, 1]} : vector<2x20x8xbf16> to vector<2x16x8xbf16>
    %19 = vector.shape_cast %18 : vector<2x16x8xbf16> to vector<32x8xbf16>
    %c2 = arith.constant 2 : index
    %c0_16 = arith.constant 0 : index
    %c0_17 = arith.constant 0 : index
    %20 = vector.load %arg2[%c2, %c0_16, %c0_17] : memref<5x8x128xbf16, #tpu.memory_space<vmem>>, vector<1x8x128xbf16>
    %21 = vector.shape_cast %20 : vector<1x8x128xbf16> to vector<8x128xbf16>
    %cst_18 = arith.constant dense<0.000000e+00> : vector<32x128xf32>
    %22 = tpu.matmul %19, %21, %cst_18 {dimension_numbers = #tpu.dot_dimension_numbers<[1], [0], [0], [1], [0, 0, 1, 1], [], []>} : vector<32x8xbf16>, vector<8x128xbf16>, vector<32x128xf32> -> vector<32x128xf32>
    %23 = arith.addf %17, %22 : vector<32x128xf32>
    %24 = vector.extract_strided_slice %3 {offsets = [0, 3, 0], sizes = [2, 16, 8], strides = [1, 1, 1]} : vector<2x20x8xbf16> to vector<2x16x8xbf16>
    %25 = vector.shape_cast %24 : vector<2x16x8xbf16> to vector<32x8xbf16>
    %c3 = arith.constant 3 : index
    %c0_19 = arith.constant 0 : index
    %c0_20 = arith.constant 0 : index
    %26 = vector.load %arg2[%c3, %c0_19, %c0_20] : memref<5x8x128xbf16, #tpu.memory_space<vmem>>, vector<1x8x128xbf16>
    %27 = vector.shape_cast %26 : vector<1x8x128xbf16> to vector<8x128xbf16>
    %cst_21 = arith.constant dense<0.000000e+00> : vector<32x128xf32>
    %28 = tpu.matmul %25, %27, %cst_21 {dimension_numbers = #tpu.dot_dimension_numbers<[1], [0], [0], [1], [0, 0, 1, 1], [], []>} : vector<32x8xbf16>, vector<8x128xbf16>, vector<32x128xf32> -> vector<32x128xf32>
    %29 = arith.addf %23, %28 : vector<32x128xf32>
    %30 = vector.extract_strided_slice %3 {offsets = [0, 4, 0], sizes = [2, 16, 8], strides = [1, 1, 1]} : vector<2x20x8xbf16> to vector<2x16x8xbf16>
    %31 = vector.shape_cast %30 : vector<2x16x8xbf16> to vector<32x8xbf16>
    %c4 = arith.constant 4 : index
    %c0_22 = arith.constant 0 : index
    %c0_23 = arith.constant 0 : index
    %32 = vector.load %arg2[%c4, %c0_22, %c0_23] : memref<5x8x128xbf16, #tpu.memory_space<vmem>>, vector<1x8x128xbf16>
    %33 = vector.shape_cast %32 : vector<1x8x128xbf16> to vector<8x128xbf16>
    %cst_24 = arith.constant dense<0.000000e+00> : vector<32x128xf32>
    %34 = tpu.matmul %31, %33, %cst_24 {dimension_numbers = #tpu.dot_dimension_numbers<[1], [0], [0], [1], [0, 0, 1, 1], [], []>} : vector<32x8xbf16>, vector<8x128xbf16>, vector<32x128xf32> -> vector<32x128xf32>
    %35 = arith.addf %29, %34 : vector<32x128xf32>
    %cst_25 = arith.constant 0.000000e+00 : f32
    %36 = vector.broadcast %cst_25 : f32 to vector<32x128xf32>
    %37 = arith.cmpf oge, %35, %36 : vector<32x128xf32>
    %cst_26 = arith.constant 0.00999999977 : f32
    %38 = vector.broadcast %cst_26 : f32 to vector<32x128xf32>
    %39 = arith.mulf %38, %35 : vector<32x128xf32>
    %40 = arith.select %37, %35, %39 : vector<32x128xi1>, vector<32x128xf32>
    %41 = vector.shape_cast %40 : vector<32x128xf32> to vector<2x16x128xf32>
    %42 = arith.truncf %41 : vector<2x16x128xf32> to vector<2x16x128xbf16>
    %c0_27 = arith.constant 0 : index
    %c2_28 = arith.constant 2 : index
    %c0_29 = arith.constant 0 : index
    %43 = vector.load %arg11[%c0_27, %c2_28, %c0_29] : memref<2x20x128xbf16, #tpu.memory_space<vmem>>, vector<2x16x128xbf16>
    tpu.vector_store %arg11[%c0_27, %c2_28, %c0_29], %42 {strides = array<i32>} : memref<2x20x128xbf16, #tpu.memory_space<vmem>>, vector<2x16x128xbf16>,
    %c0_30 = arith.constant 0 : index
    %c0_31 = arith.constant 0 : index
    %c0_32 = arith.constant 0 : index
    %44 = vector.load %arg11[%c0_30, %c0_31, %c0_32] : memref<2x20x128xbf16, #tpu.memory_space<vmem>>, vector<2x20x128xbf16>
    %45 = vector.extract_strided_slice %44 {offsets = [0, 0, 0], sizes = [2, 16, 128], strides = [1, 1, 1]} : vector<2x20x128xbf16> to vector<2x16x128xbf16>
    %46 = vector.shape_cast %45 : vector<2x16x128xbf16> to vector<32x128xbf16>
    %c0_33 = arith.constant 0 : index
    %c0_34 = arith.constant 0 : index
    %c0_35 = arith.constant 0 : index
    %47 = vector.load %arg4[%c0_33, %c0_34, %c0_35] : memref<5x128x128xbf16, #tpu.memory_space<vmem>>, vector<1x128x128xbf16>
    %48 = vector.shape_cast %47 : vector<1x128x128xbf16> to vector<128x128xbf16>
    %cst_36 = arith.constant dense<0.000000e+00> : vector<32x128xf32>
    %49 = tpu.matmul %46, %48, %cst_36 {dimension_numbers = #tpu.dot_dimension_numbers<[1], [0], [0], [1], [0, 0, 1, 1], [], []>} : vector<32x128xbf16>, vector<128x128xbf16>, vector<32x128xf32> -> vector<32x128xf32>
    %c0_37 = arith.constant 0 : index
    %c0_38 = arith.constant 0 : index
    %50 = vector.load %arg5[%c0_37, %c0_38] : memref<1x128xf32, #tpu.memory_space<vmem>>, vector<1x128xf32>
    %51 = vector.broadcast %50 : vector<1x128xf32> to vector<32x128xf32>
    %52 = arith.addf %49, %51 : vector<32x128xf32>
    %53 = vector.extract_strided_slice %44 {offsets = [0, 1, 0], sizes = [2, 16, 128], strides = [1, 1, 1]} : vector<2x20x128xbf16> to vector<2x16x128xbf16>
    %54 = vector.shape_cast %53 : vector<2x16x128xbf16> to vector<32x128xbf16>
    %c1_39 = arith.constant 1 : index
    %c0_40 = arith.constant 0 : index
    %c0_41 = arith.constant 0 : index
    %55 = vector.load %arg4[%c1_39, %c0_40, %c0_41] : memref<5x128x128xbf16, #tpu.memory_space<vmem>>, vector<1x128x128xbf16>
    %56 = vector.shape_cast %55 : vector<1x128x128xbf16> to vector<128x128xbf16>
    %cst_42 = arith.constant dense<0.000000e+00> : vector<32x128xf32>
    %57 = tpu.matmul %54, %56, %cst_42 {dimension_numbers = #tpu.dot_dimension_numbers<[1], [0], [0], [1], [0, 0, 1, 1], [], []>} : vector<32x128xbf16>, vector<128x128xbf16>, vector<32x128xf32> -> vector<32x128xf32>
    %58 = arith.addf %52, %57 : vector<32x128xf32>
    %59 = vector.extract_strided_slice %44 {offsets = [0, 2, 0], sizes = [2, 16, 128], strides = [1, 1, 1]} : vector<2x20x128xbf16> to vector<2x16x128xbf16>
    %60 = vector.shape_cast %59 : vector<2x16x128xbf16> to vector<32x128xbf16>
    %c2_43 = arith.constant 2 : index
    %c0_44 = arith.constant 0 : index
    %c0_45 = arith.constant 0 : index
    %61 = vector.load %arg4[%c2_43, %c0_44, %c0_45] : memref<5x128x128xbf16, #tpu.memory_space<vmem>>, vector<1x128x128xbf16>
    %62 = vector.shape_cast %61 : vector<1x128x128xbf16> to vector<128x128xbf16>
    %cst_46 = arith.constant dense<0.000000e+00> : vector<32x128xf32>
    %63 = tpu.matmul %60, %62, %cst_46 {dimension_numbers = #tpu.dot_dimension_numbers<[1], [0], [0], [1], [0, 0, 1, 1], [], []>} : vector<32x128xbf16>, vector<128x128xbf16>, vector<32x128xf32> -> vector<32x128xf32>
    %64 = arith.addf %58, %63 : vector<32x128xf32>
    %65 = vector.extract_strided_slice %44 {offsets = [0, 3, 0], sizes = [2, 16, 128], strides = [1, 1, 1]} : vector<2x20x128xbf16> to vector<2x16x128xbf16>
    %66 = vector.shape_cast %65 : vector<2x16x128xbf16> to vector<32x128xbf16>
    %c3_47 = arith.constant 3 : index
    %c0_48 = arith.constant 0 : index
    %c0_49 = arith.constant 0 : index
    %67 = vector.load %arg4[%c3_47, %c0_48, %c0_49] : memref<5x128x128xbf16, #tpu.memory_space<vmem>>, vector<1x128x128xbf16>
    %68 = vector.shape_cast %67 : vector<1x128x128xbf16> to vector<128x128xbf16>
    %cst_50 = arith.constant dense<0.000000e+00> : vector<32x128xf32>
    %69 = tpu.matmul %66, %68, %cst_50 {dimension_numbers = #tpu.dot_dimension_numbers<[1], [0], [0], [1], [0, 0, 1, 1], [], []>} : vector<32x128xbf16>, vector<128x128xbf16>, vector<32x128xf32> -> vector<32x128xf32>
    %70 = arith.addf %64, %69 : vector<32x128xf32>
    %71 = vector.extract_strided_slice %44 {offsets = [0, 4, 0], sizes = [2, 16, 128], strides = [1, 1, 1]} : vector<2x20x128xbf16> to vector<2x16x128xbf16>
    %72 = vector.shape_cast %71 : vector<2x16x128xbf16> to vector<32x128xbf16>
    %c4_51 = arith.constant 4 : index
    %c0_52 = arith.constant 0 : index
    %c0_53 = arith.constant 0 : index
    %73 = vector.load %arg4[%c4_51, %c0_52, %c0_53] : memref<5x128x128xbf16, #tpu.memory_space<vmem>>, vector<1x128x128xbf16>
    %74 = vector.shape_cast %73 : vector<1x128x128xbf16> to vector<128x128xbf16>
    %cst_54 = arith.constant dense<0.000000e+00> : vector<32x128xf32>
    %75 = tpu.matmul %72, %74, %cst_54 {dimension_numbers = #tpu.dot_dimension_numbers<[1], [0], [0], [1], [0, 0, 1, 1], [], []>} : vector<32x128xbf16>, vector<128x128xbf16>, vector<32x128xf32> -> vector<32x128xf32>
    %76 = arith.addf %70, %75 : vector<32x128xf32>
    %cst_55 = arith.constant 0.000000e+00 : f32
    %77 = vector.broadcast %cst_55 : f32 to vector<32x128xf32>
    %78 = arith.cmpf oge, %76, %77 : vector<32x128xf32>
    %cst_56 = arith.constant 0.00999999977 : f32
    %79 = vector.broadcast %cst_56 : f32 to vector<32x128xf32>
    %80 = arith.mulf %79, %76 : vector<32x128xf32>
    %81 = arith.select %78, %76, %80 : vector<32x128xi1>, vector<32x128xf32>
    %82 = vector.shape_cast %81 : vector<32x128xf32> to vector<2x16x128xf32>
    %83 = arith.truncf %82 : vector<2x16x128xf32> to vector<2x16x128xbf16>
    %c0_57 = arith.constant 0 : index
    %c2_58 = arith.constant 2 : index
    %c0_59 = arith.constant 0 : index
    %84 = vector.load %arg11[%c0_57, %c2_58, %c0_59] : memref<2x20x128xbf16, #tpu.memory_space<vmem>>, vector<2x16x128xbf16>
    tpu.vector_store %arg11[%c0_57, %c2_58, %c0_59], %83 {strides = array<i32>} : memref<2x20x128xbf16, #tpu.memory_space<vmem>>, vector<2x16x128xbf16>,
    %c0_60 = arith.constant 0 : index
    %c0_61 = arith.constant 0 : index
    %c0_62 = arith.constant 0 : index
    %85 = vector.load %arg11[%c0_60, %c0_61, %c0_62] : memref<2x20x128xbf16, #tpu.memory_space<vmem>>, vector<2x20x128xbf16>
    %86 = vector.extract_strided_slice %85 {offsets = [0, 0, 0], sizes = [2, 16, 128], strides = [1, 1, 1]} : vector<2x20x128xbf16> to vector<2x16x128xbf16>
    %87 = vector.shape_cast %86 : vector<2x16x128xbf16> to vector<32x128xbf16>
    %c0_63 = arith.constant 0 : index
    %c0_64 = arith.constant 0 : index
    %c0_65 = arith.constant 0 : index
    %88 = vector.load %arg6[%c0_63, %c0_64, %c0_65] : memref<5x128x128xbf16, #tpu.memory_space<vmem>>, vector<1x128x128xbf16>
    %89 = vector.shape_cast %88 : vector<1x128x128xbf16> to vector<128x128xbf16>
    %cst_66 = arith.constant dense<0.000000e+00> : vector<32x128xf32>
    %90 = tpu.matmul %87, %89, %cst_66 {dimension_numbers = #tpu.dot_dimension_numbers<[1], [0], [0], [1], [0, 0, 1, 1], [], []>} : vector<32x128xbf16>, vector<128x128xbf16>, vector<32x128xf32> -> vector<32x128xf32>
    %c0_67 = arith.constant 0 : index
    %c0_68 = arith.constant 0 : index
    %91 = vector.load %arg7[%c0_67, %c0_68] : memref<1x128xf32, #tpu.memory_space<vmem>>, vector<1x128xf32>
    %92 = vector.broadcast %91 : vector<1x128xf32> to vector<32x128xf32>
    %93 = arith.addf %90, %92 : vector<32x128xf32>
    %94 = vector.extract_strided_slice %85 {offsets = [0, 1, 0], sizes = [2, 16, 128], strides = [1, 1, 1]} : vector<2x20x128xbf16> to vector<2x16x128xbf16>
    %95 = vector.shape_cast %94 : vector<2x16x128xbf16> to vector<32x128xbf16>
    %c1_69 = arith.constant 1 : index
    %c0_70 = arith.constant 0 : index
    %c0_71 = arith.constant 0 : index
    %96 = vector.load %arg6[%c1_69, %c0_70, %c0_71] : memref<5x128x128xbf16, #tpu.memory_space<vmem>>, vector<1x128x128xbf16>
    %97 = vector.shape_cast %96 : vector<1x128x128xbf16> to vector<128x128xbf16>
    %cst_72 = arith.constant dense<0.000000e+00> : vector<32x128xf32>
    %98 = tpu.matmul %95, %97, %cst_72 {dimension_numbers = #tpu.dot_dimension_numbers<[1], [0], [0], [1], [0, 0, 1, 1], [], []>} : vector<32x128xbf16>, vector<128x128xbf16>, vector<32x128xf32> -> vector<32x128xf32>
    %99 = arith.addf %93, %98 : vector<32x128xf32>
    %100 = vector.extract_strided_slice %85 {offsets = [0, 2, 0], sizes = [2, 16, 128], strides = [1, 1, 1]} : vector<2x20x128xbf16> to vector<2x16x128xbf16>
    %101 = vector.shape_cast %100 : vector<2x16x128xbf16> to vector<32x128xbf16>
    %c2_73 = arith.constant 2 : index
    %c0_74 = arith.constant 0 : index
    %c0_75 = arith.constant 0 : index
    %102 = vector.load %arg6[%c2_73, %c0_74, %c0_75] : memref<5x128x128xbf16, #tpu.memory_space<vmem>>, vector<1x128x128xbf16>
    %103 = vector.shape_cast %102 : vector<1x128x128xbf16> to vector<128x128xbf16>
    %cst_76 = arith.constant dense<0.000000e+00> : vector<32x128xf32>
    %104 = tpu.matmul %101, %103, %cst_76 {dimension_numbers = #tpu.dot_dimension_numbers<[1], [0], [0], [1], [0, 0, 1, 1], [], []>} : vector<32x128xbf16>, vector<128x128xbf16>, vector<32x128xf32> -> vector<32x128xf32>
    %105 = arith.addf %99, %104 : vector<32x128xf32>
    %106 = vector.extract_strided_slice %85 {offsets = [0, 3, 0], sizes = [2, 16, 128], strides = [1, 1, 1]} : vector<2x20x128xbf16> to vector<2x16x128xbf16>
    %107 = vector.shape_cast %106 : vector<2x16x128xbf16> to vector<32x128xbf16>
    %c3_77 = arith.constant 3 : index
    %c0_78 = arith.constant 0 : index
    %c0_79 = arith.constant 0 : index
    %108 = vector.load %arg6[%c3_77, %c0_78, %c0_79] : memref<5x128x128xbf16, #tpu.memory_space<vmem>>, vector<1x128x128xbf16>
    %109 = vector.shape_cast %108 : vector<1x128x128xbf16> to vector<128x128xbf16>
    %cst_80 = arith.constant dense<0.000000e+00> : vector<32x128xf32>
    %110 = tpu.matmul %107, %109, %cst_80 {dimension_numbers = #tpu.dot_dimension_numbers<[1], [0], [0], [1], [0, 0, 1, 1], [], []>} : vector<32x128xbf16>, vector<128x128xbf16>, vector<32x128xf32> -> vector<32x128xf32>
    %111 = arith.addf %105, %110 : vector<32x128xf32>
    %112 = vector.extract_strided_slice %85 {offsets = [0, 4, 0], sizes = [2, 16, 128], strides = [1, 1, 1]} : vector<2x20x128xbf16> to vector<2x16x128xbf16>
    %113 = vector.shape_cast %112 : vector<2x16x128xbf16> to vector<32x128xbf16>
    %c4_81 = arith.constant 4 : index
    %c0_82 = arith.constant 0 : index
    %c0_83 = arith.constant 0 : index
    %114 = vector.load %arg6[%c4_81, %c0_82, %c0_83] : memref<5x128x128xbf16, #tpu.memory_space<vmem>>, vector<1x128x128xbf16>
    %115 = vector.shape_cast %114 : vector<1x128x128xbf16> to vector<128x128xbf16>
    %cst_84 = arith.constant dense<0.000000e+00> : vector<32x128xf32>
    %116 = tpu.matmul %113, %115, %cst_84 {dimension_numbers = #tpu.dot_dimension_numbers<[1], [0], [0], [1], [0, 0, 1, 1], [], []>} : vector<32x128xbf16>, vector<128x128xbf16>, vector<32x128xf32> -> vector<32x128xf32>
    %117 = arith.addf %111, %116 : vector<32x128xf32>
    %cst_85 = arith.constant 0.000000e+00 : f32
    %118 = vector.broadcast %cst_85 : f32 to vector<32x128xf32>
    %119 = arith.cmpf oge, %117, %118 : vector<32x128xf32>
    %cst_86 = arith.constant 0.00999999977 : f32
    %120 = vector.broadcast %cst_86 : f32 to vector<32x128xf32>
    %121 = arith.mulf %120, %117 : vector<32x128xf32>
    %122 = arith.select %119, %117, %121 : vector<32x128xi1>, vector<32x128xf32>
    %123 = vector.shape_cast %122 : vector<32x128xf32> to vector<2x16x128xf32>
    %cst_87 = arith.constant dense<0.000000e+00> : vector<2x128xf32>
    %124 = vector.multi_reduction <add>, %123, %cst_87 [1] : vector<2x16x128xf32> to vector<2x128xf32>
    %cst_88 = arith.constant 1.600000e+01 : f32
    %125 = vector.broadcast %cst_88 : f32 to vector<2x128xf32>
    %126 = arith.divf %124, %125 : vector<2x128xf32>
    %c0_89 = arith.constant 0 : index
    %c0_90 = arith.constant 0 : index
    %127 = vector.load %arg8[%c0_89, %c0_90] : memref<128x5xf32, #tpu.memory_space<vmem>>, vector<128x5xf32>
    %cst_91 = arith.constant dense<0.000000e+00> : vector<2x5xf32>
    %128 = tpu.matmul %126, %127, %cst_91 {dimension_numbers = #tpu.dot_dimension_numbers<[1], [0], [0], [1], [0, 0, 1, 1], [], []>} : vector<2x128xf32>, vector<128x5xf32>, vector<2x5xf32> -> vector<2x5xf32>
    %c0_92 = arith.constant 0 : index
    %c0_93 = arith.constant 0 : index
    %129 = vector.load %arg9[%c0_92, %c0_93] : memref<1x5xf32, #tpu.memory_space<vmem>>, vector<1x5xf32>
    %130 = vector.broadcast %129 : vector<1x5xf32> to vector<2x5xf32>
    %131 = arith.addf %128, %130 : vector<2x5xf32>
    %c0_94 = arith.constant 0 : index
    %c0_95 = arith.constant 0 : index
    %132 = vector.load %arg10[%c0_94, %c0_95] : memref<2x5xf32, #tpu.memory_space<vmem>>, vector<2x5xf32>
    tpu.vector_store %arg10[%c0_94, %c0_95], %131 {strides = array<i32>} : memref<2x5xf32, #tpu.memory_space<vmem>>, vector<2x5xf32>,
    return
  }
  func.func @transform_0(%arg0: i32) -> (i32, i32, i32) {
    %c0_i32 = arith.constant 0 : i32
    %c0_i32_0 = arith.constant 0 : i32
    %c0_i32_1 = arith.constant 0 : i32
    return %arg0, %c0_i32, %c0_i32_0 : i32, i32, i32
  }
  func.func @transform_1(%arg0: i32) -> (i32, i32, i32) {
    %c0_i32 = arith.constant 0 : i32
    %c0_i32_0 = arith.constant 0 : i32
    %c0_i32_1 = arith.constant 0 : i32
    %c0_i32_2 = arith.constant 0 : i32
    return %c0_i32, %c0_i32_0, %c0_i32_1 : i32, i32, i32
  }
  func.func @transform_2(%arg0: i32) -> (i32, i32) {
    %c0_i32 = arith.constant 0 : i32
    %c0_i32_0 = arith.constant 0 : i32
    %c0_i32_1 = arith.constant 0 : i32
    return %c0_i32, %c0_i32_0 : i32, i32
  }
  func.func @transform_3(%arg0: i32) -> (i32, i32, i32) {
    %c0_i32 = arith.constant 0 : i32
    %c0_i32_0 = arith.constant 0 : i32
    %c0_i32_1 = arith.constant 0 : i32
    %c0_i32_2 = arith.constant 0 : i32
    return %c0_i32, %c0_i32_0, %c0_i32_1 : i32, i32, i32
  }
  func.func @transform_4(%arg0: i32) -> (i32, i32) {
    %c0_i32 = arith.constant 0 : i32
    %c0_i32_0 = arith.constant 0 : i32
    %c0_i32_1 = arith.constant 0 : i32
    return %c0_i32, %c0_i32_0 : i32, i32
  }
  func.func @transform_5(%arg0: i32) -> (i32, i32, i32) {
    %c0_i32 = arith.constant 0 : i32
    %c0_i32_0 = arith.constant 0 : i32
    %c0_i32_1 = arith.constant 0 : i32
    %c0_i32_2 = arith.constant 0 : i32
    return %c0_i32, %c0_i32_0, %c0_i32_1 : i32, i32, i32
  }
  func.func @transform_6(%arg0: i32) -> (i32, i32) {
    %c0_i32 = arith.constant 0 : i32
    %c0_i32_0 = arith.constant 0 : i32
    %c0_i32_1 = arith.constant 0 : i32
    return %c0_i32, %c0_i32_0 : i32, i32
  }
  func.func @transform_7(%arg0: i32) -> (i32, i32) {
    %c0_i32 = arith.constant 0 : i32
    %c0_i32_0 = arith.constant 0 : i32
    %c0_i32_1 = arith.constant 0 : i32
    return %c0_i32, %c0_i32_0 : i32, i32
  }
  func.func @transform_8(%arg0: i32) -> (i32, i32) {
    %c0_i32 = arith.constant 0 : i32
    %c0_i32_0 = arith.constant 0 : i32
    %c0_i32_1 = arith.constant 0 : i32
    return %c0_i32, %c0_i32_0 : i32, i32
  }
  func.func @transform_9(%arg0: i32) -> (i32, i32) {
    %c0_i32 = arith.constant 0 : i32
    %c0_i32_0 = arith.constant 0 : i32
    return %arg0, %c0_i32 : i32, i32
  }
}

</mosaic_0001>

<bundles_post_ra>
// kernel: tpu_custom_call.1
= control target key start
LH: loop header
LB: loop body
LE: loop exit
PB: predicated region body
PF: predicated region fallthrough
CT: control target
= control target key end

     0   :  { %14 = vsyncpa [#allocation4], 0  ;;  %s3532_s0 = inlined_call_operand.vmem [shape: bf16[2,20,8], index: 0, kind: input, shape index: {}]   ;;  %s3533_s1 = inlined_call_operand.vmem [shape: bf16[5,8,128], index: 1, kind: input, shape index: {}]   ;;  %s3534_s2 = inlined_call_operand.vmem [shape: f32[1,128], index: 2, kind: input, shape index: {}]   ;;  %s3535_s3 = inlined_call_operand.hbm [shape: bf16[5,128,128], index: 3, kind: input, shape index: {}]   ;;  %s3536_s4 = inlined_call_operand.vmem [shape: f32[1,128], index: 4, kind: input, shape index: {}]   ;;  %s3537_s5 = inlined_call_operand.hbm [shape: bf16[5,128,128], index: 5, kind: input, shape index: {}]   ;;  %s3538_s6 = inlined_call_operand.vmem [shape: f32[1,128], index: 6, kind: input, shape index: {}]   ;;  %s3539_s7 = inlined_call_operand.vmem [shape: f32[128,5], index: 7, kind: input, shape index: {}]   ;;  %s3540_s8 = inlined_call_operand.vmem [shape: f32[1,5], index: 8, kind: input, shape index: {}]   ;;  %s3541_s9 = inlined_call_operand.hbm [shape: f32[2,5], index: 9, kind: output, shape index: {}]  }
   0x1   :  { %15 = vsyncpa [#allocation7], 0 }
   0x2   :  { %16 = vsyncpa [#allocation5], 0  ;;  %s3008_s30 = smov [#allocation3]  }
   0x3   :  { %s28_s10 = sshll.u32 %s3008_s30, 4  ;;  %s29_s10 = int_to_ptr.vmem [resolvable:$true] %s28_s10 }
   0x4   :  { %s2950_s11 = scalar_lea.vmem %s29_s10, 5120  ;;  %p2955_p1 = scmp.lt.s32.totalorder %s29_s10, %s29_s10 }
   0x5   :  { %p2951_p0 = scmp.ne.s32.totalorder %s29_s10, %s2950_s11  ;;  %p2956_p2 = scmp.lt.s32.totalorder %s2950_s11, %s2950_s11 }
   0x7   :  { %p2957_p3 = por %p2956_p2, %p2955_p1 }
   0x9   :  { %p2958_p4 = pnand %p2957_p3, %p2951_p0 }
   0xb   :  { %2961 = shalt.err (!%p2958_p4)
}
   0xc   :  { %s3009_s12 = smov 64   ;;  %s3010_s13 = smov 4  }
   0xd   :  { %34 = dma.hbm_to_vmem [thread:$0]  %s3535_s3, 5120, %s29_s10, [#allocation4], %s3009_s12, %s3009_s12, %s3010_s13  }
   0xe   :  { %s3011_s16 = smov [#allocation6]  }
   0xf   :  { %s42_s17 = sshll.u32 %s3011_s16, 4  ;;  %s43_s17 = int_to_ptr.vmem [resolvable:$true] %s42_s17 }
  0x10   :  { %s2970_s18 = scalar_lea.vmem %s43_s17, 5120  ;;  %p2975_p6 = scmp.lt.s32.totalorder %s43_s17, %s43_s17 }
  0x11   :  { %p2971_p5 = scmp.ne.s32.totalorder %s43_s17, %s2970_s18  ;;  %p2976_p7 = scmp.lt.s32.totalorder %s2970_s18, %s2970_s18 }
  0x13   :  { %p2977_p8 = por %p2976_p7, %p2975_p6 }
  0x15   :  { %p2978_p9 = pnand %p2977_p8, %p2971_p5 }
  0x17   :  { %2981 = shalt.err (!%p2978_p9)
}
  0x18   :  { %48 = dma.hbm_to_vmem [thread:$0]  %s3537_s5, 5120, %s43_s17, [#allocation7], %s3009_s12, %s3009_s12, %s3010_s13  }
  0x19   :  { %3002 = dma.done.wait [#allocation4], 5120  }
  0x1a   :  { %3003 = vsyncadd [#allocation4], 4294962176 }
  0x1b   :  { %3004 = dma.done.wait [#allocation7], 5120  }
  0x1c   :  { %3005 = vsyncadd [#allocation7], 4294962176  ;;  %vm97_vm0 = vcmask 1043456   ;;  %vm90_vm1 = vcmask 64512   ;;  %vm150_vm2 = vsmask.f32 3328 }
  0x1d   :  { %vm151_vm3 = vsmask.f32 7440  ;;  %vm273_vm4 = vcmask 1042432   ;;  %vm274_vm5 = vcmask 1046532   ;;  %v72_v0 = vld [vmem:[%s3533_s1] sm:$0xf] }
  0x1e   :  { %v3078_v1 = vld [vmem:[%s3532_s0] sm:$0xf]  ;;  %v3083_v2 = vld [vmem:[%s3532_s0 + $0x4] sm:$0xf]  ;;  %2843 = vmatprep.subr.msk.bf16.mxu0 %vm97_vm0, %v72_v0  ;;  %v99_v3 = vsel %vm97_vm0, %v72_v0, 0  ;;  %vm3150_vm8 = vmor %vm150_vm2, %vm151_vm3  ;;  %vm463_vm10 = vcmask 1041408  }
  0x1f   :  { %v2291_v4 = vcombine.low %v3078_v1, %v3083_v2  ;;  %v154_v5 = vshrl.u32 %v3078_v1, 16  ;;  %v157_v6 = vshll.u32 %v3078_v1, 16  ;;  %v3094_v7 = vld [vmem:[%s3532_s0 + $0xc] sm:$0xf]  ;;  %2579 = vmatpush3.bf16.msra.mxu0 %v99_v3  ;;  %v163_v8 = vshll.u32 %v3083_v2, 16  ;;  %vm3164_vm9 = vmor %vm273_vm4, %vm274_vm5  ;;  %v2924_v33 = vld [vmem:[#allocation6 + $0x98] sm:$0xff]  }
  0x20   :  { %v167_v9 = vshrl.u32 %v3083_v2, 16  ;;  %v3101_v10 = vld [vmem:[%s3532_s0 + $0x10] sm:$0xf]  ;;  %v178_v11 = vshrl.u32 %v3094_v7, 16  ;;  %v181_v12 = vshll.u32 %v3094_v7, 16  ;;  %v2300_v45 = vrot.slane %v3078_v1, 9 }
  0x21   :  { %2580 = vmatprep.mubr.msk.bf16.mxu0 %vm90_vm1, %v2291_v4  ;;  %v2292_v13 = vcombine.low %v3094_v7, %v3101_v10  ;;  %v191_v14 = vshrl.u32 %v3101_v10, 16  ;;  %v2295_v15 = vld [vmem:[%s3533_s1 + $0x4] sm:$0xf]  ;;  %v3115_v16 = vld [vmem:[%s3532_s0 + $0x8] sm:$0x3]  ;;  %v156_v17 = vrot.slane %v154_v5, 4 }
  0x22   :  { %2844 = vmatprep.subr.msk.bf16.mxu0 %vm97_vm0, %v2295_v15  ;;  %v216_v18 = vsel %vm97_vm0, %v2295_v15, 0  ;;  %v159_v19 = vrot.slane %v157_v6, 5  ;;  %v165_v20 = vrot.slane %v163_v8, 5  ;;  %v169_v21 = vrot.slane %v167_v9, 4  ;;  %v3130_v22 = vld [vmem:[%s3532_s0 + $0x14] sm:$0x3] }
  0x23   :  { %2581 = vmatmul.mubr.msk.bf16.vlgmr.msra.gmra.mxu0 %vm90_vm1, %v2292_v13  ;;  %v173_v23 = vshll.u32 %v3115_v16, 16  ;;  %v180_v24 = vrot.slane %v178_v11, 4  ;;  %v183_v25 = vrot.slane %v181_v12, 5  ;;  %v187_v26 = vshll.u32 %v3101_v10, 16  ;;  %v2302_v27 = vld [vmem:[%s3533_s1 + $0x8] sm:$0xf] }
  0x24   :  { %vm360_vm6 = vsmask.f32 2304  ;;  %vm361_vm7 = vsmask.f32 6416  ;;  %2585 = vmatpush3.bf16.msra.mxu0 %v216_v18  ;;  %v160_v28 = vor.u32 %v159_v19, %v156_v17  ;;  %v170_v29 = vor.u32 %v169_v21, %v165_v20  ;;  %v2307_v32 = vld [vmem:[%s3533_s1 + $0xc] sm:$0xf] }
  0x25   :  { %v193_v30 = vrot.slane %v191_v14, 4  ;;  %v197_v31 = vshll.u32 %v3130_v22, 16  ;;  %v175_v34 = vrot.slane %v173_v23, 5  ;;  %v184_v35 = vor.u32 %v183_v25, %v180_v24  ;;  %2845 = vmatprep.subr.msk.bf16.mxu0 %vm97_vm0, %v2302_v27  ;;  %2846 = vmatprep.subr.msk.bf16.mxu1 %vm97_vm0, %v2307_v32  ;;  %v2314_v63 = vld [vmem:[%s3533_s1 + $0x10] sm:$0xf]  ;;  %vm3206_vm12 = vmor %vm360_vm6, %vm361_vm7  ;;  %v2936_v42 = vld [vmem:[#allocation6 + $0x128] sm:$0xff]  }
  0x26   :  { %v189_v36 = vrot.slane %v187_v26, 5  ;;  %v305_v37 = vsel %vm97_vm0, %v2302_v27, 0  ;;  %v161_v38 = vrot.slane %v160_v28, 4  ;;  %v171_v39 = vrot.slane %v170_v29, 4  ;;  %s3015_s25 = smov [#allocation8]  }
  0x27   :  { %v199_v40 = vrot.slane %v197_v31, 5  ;;  %v408_v41 = vsel %vm97_vm0, %v2307_v32, 0  ;;  %v185_v43 = vrot.slane %v184_v35, 4  ;;  %v278_v46 = vrot.slane %v3083_v2, 5  ;;  %s2280_s26 = sshll.u32 %s3015_s25, 4  ;;  %s2281_s26 = int_to_ptr.vmem [resolvable:$true] %s2280_s26 }
  0x28   :  { %v194_v44 = vor.u32 %v193_v30, %v189_v36  ;;  %2597 = vmatpush3.bf16.msra.mxu1 %v408_v41  ;;  %vm464_vm11 = vcmask 1045508   ;;  %v166_v47 = vsel %vm3150_vm8, %v161_v38, %v165_v20  ;;  %v176_v48 = vsel %vm3150_vm8, %v171_v39, %v175_v34  ;;  %s2982_s27 = scalar_lea.vmem %s2281_s26, 32  ;;  %p2987_p11 = scmp.lt.s32.totalorder %s2281_s26, %s2281_s26 }
  0x29   :  { %v281_v49 = vrot.slane %v3115_v16, 5  ;;  %v2301_v50 = vrot.slane %v3094_v7, 9  ;;  %v2296_v51 = vcombine.low %v166_v47, %v176_v48  ;;  %v190_v52 = vsel %vm3150_vm8, %v185_v43, %v189_v36  ;;  %vm3228_vm13 = vmor %vm463_vm10, %vm464_vm11  ;;  %p2983_p10 = scmp.ne.s32.totalorder %s2281_s26, %s2982_s27  ;;  %p2988_p12 = scmp.lt.s32.totalorder %s2982_s27, %s2982_s27 }
  0x2a   :  { %v195_v53 = vrot.slane %v194_v44, 4  ;;  %v279_v54 = vsel %vm3164_vm9, %v2300_v45, %v278_v46  ;;  %v280_v55 = vrot.slane %v278_v46, 4  ;;  %v285_v56 = vrot.slane %v3101_v10, 5 }
  0x2b   :  { %v288_v57 = vrot.slane %v3130_v22, 5  ;;  %v363_v58 = vrot.slane %v154_v5, 5  ;;  %2586 = vmatprep.mubr.msk.bf16.mxu0 %vm90_vm1, %v2296_v51  ;;  %v364_v60 = vrot.slane %v157_v6, 6  ;;  %v367_v61 = vrot.slane %v167_v9, 5  ;;  %p2989_p13 = por %p2988_p12, %p2987_p11 }
  0x2c   :  { %v200_v59 = vsel %vm3150_vm8, %v195_v53, %v199_v40  ;;  %v368_v62 = vrot.slane %v163_v8, 6  ;;  %v282_v3 = vsel %vm3164_vm9, %v280_v55, %v281_v49  ;;  %v286_v4 = vsel %vm3164_vm9, %v2301_v50, %v285_v56  ;;  %v2859_v53 = vld [vmem:[#allocation3 + $0x30] sm:$0xff]   ;;  %v2861_v55 = vld [vmem:[#allocation3 + $0x78] sm:$0xff]  }
  0x2d   :  { %v2297_v0 = vcombine.low %v190_v52, %v200_v59  ;;  %v287_v5 = vrot.slane %v285_v56, 4  ;;  %v2303_v13 = vcombine.low %v279_v54, %v282_v3  ;;  %v365_v6 = vor.u32 %v364_v60, %v363_v58  ;;  %v2858_v52 = vld [vmem:[#allocation3 + $0x38] sm:$0xff]   ;;  %v2860_v54 = vld [vmem:[#allocation3 + $0x28] sm:$0xff]   ;;  %v2862_v56 = vld [vmem:[#allocation3 + $0x20] sm:$0xff]   ;;  %p2990_p0 = pnand %p2989_p13, %p2983_p10 }
  0x2e   :  { %v369_v15 = vor.u32 %v368_v62, %v367_v61  ;;  %v372_v9 = vshrl.u32 %v3115_v16, 16  ;;  %v375_v18 = vrot.slane %v173_v23, 6  ;;  %v378_v19 = vrot.slane %v178_v11, 5  ;;  %2608 = vmatprep.subr.bf16.mxu1 %v2858_v52  ;;  %v2864_v58 = vld [vmem:[#allocation3 + $0x18] sm:$0xff]   ;;  %v2865_v59 = vld [vmem:[#allocation3 + $0x68] sm:$0xff]   ;;  %v2866_v61 = vld [vmem:[#allocation3 + $0x10] sm:$0xff]  }
  0x2f   :  { %2587 = vmatmul.mubr.msk.bf16.vlgmr.msra.gmra.mxu0 %vm90_vm1, %v2297_v0  ;;  %v289_v8 = vsel %vm3164_vm9, %v287_v5, %v288_v57  ;;  %v379_v20 = vrot.slane %v181_v12, 6  ;;  %v366_v24 = vrot.slane %v365_v6, 4  ;;  %v382_v29 = vrot.slane %v191_v14, 5  ;;  %v2863_v57 = vld [vmem:[#allocation3 + $0x70] sm:$0xff]   ;;  %v2867_v62 = vld [vmem:[#allocation3 + $0x60] sm:$0xff]   ;;  %v2869_v0 = vld [vmem:[#allocation3 + $0x58] sm:$0xff]  }
  0x30   :  { %2591 = vmatpush3.bf16.msra.mxu0 %v305_v37  ;;  %2592 = vmatprep.mubr.msk.bf16.mxu0 %vm90_vm1, %v2303_v13  ;;  %v2304_v21 = vcombine.low %v286_v4, %v289_v8  ;;  %v371_v25 = vrot.slane %v369_v15, 4  ;;  %v374_v27 = vrot.slane %v372_v9, 5  ;;  %v383_v23 = vrot.slane %v187_v26, 6  ;;  %v2870_v3 = vld [vmem:[#allocation3] sm:$0xff]   ;;  %v2871_v4 = vld [vmem:[#allocation3 + $0x50] sm:$0xff]   ;;  %v3257_v5 = vld [vmem:[#allocation3 + $0xb8] sm:$0xff]  }
  0x31   :  { %2847 = vmatprep.subr.msk.bf16.mxu0 %vm97_vm0, %v2314_v63  ;;  %v380_v28 = vor.u32 %v379_v20, %v378_v19  ;;  %v387_v11 = vshrl.u32 %v3130_v22, 16  ;;  %v370_v12 = vsel %vm3206_vm12, %v366_v24, %v369_v15  ;;  %v390_v32 = vrot.slane %v197_v31, 6  ;;  %v2875_v13 = vld [vmem:[#allocation3 + $0x48] sm:$0xff]   ;;  %v2877_v6 = vld [vmem:[#allocation3 + $0x40] sm:$0xff]   ;;  %v3260_v15 = vld [vmem:[#allocation3 + $0xf8] sm:$0xff]  }
  0x32   :  { %v376_v30 = vor.u32 %v375_v18, %v374_v27  ;;  %v495_v34 = vsel %vm97_vm0, %v2314_v63, 0  ;;  %v384_v36 = vor.u32 %v383_v23, %v382_v29  ;;  %v2312_v26 = vrot.slane %v3078_v1, 10  ;;  %v2868_v63 = vld [vmem:[#allocation3 + $0x8] sm:$0xff]   ;;  %v2187_v14 = vld [vmem:[%s3539_s7 + $0x68] sm:$0xff] }
  0x33   :  { %v381_v35 = vrot.slane %v380_v28, 4  ;;  %v389_v37 = vrot.slane %v387_v11, 5  ;;  %v468_v39 = vrot.slane %v3083_v2, 6  ;;  %v471_v31 = vrot.slane %v3115_v16, 6  ;;  %v2290_v24 = vld [vmem:[%s3534_s2] ss:$0 sm:$0xff] }
  0x34   :  { %v377_v38 = vsel %vm3206_vm12, %v371_v25, %v376_v30  ;;  %v2313_v40 = vrot.slane %v3094_v7, 10  ;;  %v386_v44 = vrot.slane %v384_v36, 4  ;;  %v475_v1 = vrot.slane %v3101_v10, 6 }
  0x35   :  { %v2308_v41 = vcombine.low %v370_v12, %v377_v38  ;;  %v385_v43 = vsel %vm3206_vm12, %v381_v35, %v384_v36  ;;  %v391_v45 = vor.u32 %v390_v32, %v389_v37  ;;  %v469_v46 = vsel %vm3228_vm13, %v2312_v26, %v468_v39 }
  0x36   :  { %v470_v47 = vrot.slane %v468_v39, 4  ;;  %v478_v48 = vrot.slane %v3130_v22, 6  ;;  %v476_v49 = vsel %vm3228_vm13, %v2313_v40, %v475_v1  ;;  %v477_v50 = vrot.slane %v475_v1, 4 }
  0x37   :  { %2593 = vmatmul.mubr.msk.bf16.vlgmr.msra.gmra.mxu0 %vm90_vm1, %v2304_v21  ;;  %2598 = vmatprep.mubr.msk.bf16.mxu1 %vm90_vm1, %v2308_v41  ;;  %v392_v2 = vsel %vm3206_vm12, %v386_v44, %v391_v45  ;;  %v3012_v60 = vmov 0   ;;  %vm575_vm2 = vcmask 1044484  }
  0x38   :  { %v2309_v7 = vcombine.low %v385_v43, %v392_v2  ;;  %2603 = vmatpush3.bf16.msra.mxu0 %v495_v34  ;;  %v472_v16 = vsel %vm3228_vm13, %v470_v47, %v471_v31  ;;  %v479_v10 = vsel %vm3228_vm13, %v477_v50, %v478_v48  ;;  %62 = vst [vmem:[#allocation2] sm:$0x1] %v3012_v60  ;;  %65 = vst [vmem:[#allocation2 + $0x14] sm:$0x2] %v3012_v60 }
  0x39   :  { %v2315_v51 = vcombine.low %v469_v46, %v472_v16  ;;  %v2316_v22 = vcombine.low %v476_v49, %v479_v10  ;;  %2628 = vmatprep.subr.bf16.mxu0 %v2861_v55  ;;  %63 = vst [vmem:[#allocation2 + $0xc] sm:$0x1] %v3012_v60  ;;  %64 = vst [vmem:[#allocation2 + $0x8] sm:$0x2] %v3012_v60 }
  0x3a   :  { %2599 = vmatmul.mubr.msk.bf16.vlgmr.msra.gmra.mxu1 %vm90_vm1, %v2309_v7 }
  0x3b   :  { %2604 = vmatprep.mubr.msk.bf16.mxu0 %vm90_vm1, %v2315_v51  ;;  %2609 = vmatpush3.bf16.msra.mxu1 %v2858_v52 }
  0x3c   :  { %2610 = vmatprep.subr.bf16.mxu1 %v2859_v53 }
  0x3f   :  { %2605 = vmatmul.mubr.msk.bf16.vlgmr.msra.gmra.mxu0 %vm90_vm1, %v2316_v22  ;;  %2611 = vmatpush3.bf16.msra.mxu1 %v2859_v53  ;;  %vm574_vm1 = vcmask 1040384  }
  0x40   :  { %2612 = vmatprep.subr.bf16.mxu1 %v2860_v54  ;;  %2629 = vmatpush3.bf16.msra.mxu0 %v2861_v55  ;;  %vm3266_vm4 = vmor %vm574_vm1, %vm575_vm2 }
  0x41   :  { %2630 = vmatprep.subr.bf16.mxu0 %v2863_v57 }
  0x43   :  { %2613 = vmatpush3.bf16.msra.mxu1 %v2860_v54 }
  0x44   :  { %2614 = vmatprep.subr.bf16.mxu1 %v2862_v56  ;;  %2631 = vmatpush3.bf16.msra.mxu0 %v2863_v57 }
  0x45   :  { %2632 = vmatprep.subr.bf16.mxu0 %v2865_v59 }
  0x47   :  { %2615 = vmatpush3.bf16.msra.mxu1 %v2862_v56 }
  0x48   :  { %2616 = vmatprep.subr.bf16.mxu1 %v2864_v58  ;;  %2633 = vmatpush3.bf16.msra.mxu0 %v2865_v59 }
  0x49   :  { %2634 = vmatprep.subr.bf16.mxu0 %v2867_v62 }
  0x4b   :  { %2617 = vmatpush3.bf16.msra.mxu1 %v2864_v58 }
  0x4c   :  { %2618 = vmatprep.subr.bf16.mxu1 %v2866_v61  ;;  %2635 = vmatpush3.bf16.msra.mxu0 %v2867_v62 }
  0x4d   :  { %2636 = vmatprep.subr.bf16.mxu0 %v2869_v0 }
  0x4f   :  { %2619 = vmatpush3.bf16.msra.mxu1 %v2866_v61 }
  0x50   :  { %2620 = vmatprep.subr.bf16.mxu1 %v2868_v63  ;;  %2637 = vmatpush3.bf16.msra.mxu0 %v2869_v0 }
  0x51   :  { %2638 = vmatprep.subr.bf16.mxu0 %v2871_v4 }
  0x53   :  { %2621 = vmatpush3.bf16.msra.mxu1 %v2868_v63 }
  0x54   :  { %2622 = vmatprep.subr.bf16.mxu1 %v2870_v3  ;;  %2639 = vmatpush3.bf16.msra.mxu0 %v2871_v4 }
  0x55   :  { %2640 = vmatprep.subr.bf16.mxu0 %v2875_v13 }
  0x57   :  { %2623 = vmatpush3.bf16.msra.mxu1 %v2870_v3 }
  0x58   :  { %2648 = vmatprep.subr.bf16.mxu1 %v3257_v5  ;;  %2641 = vmatpush3.bf16.msra.mxu0 %v2875_v13 }
  0x59   :  { %2642 = vmatprep.subr.bf16.mxu0 %v2877_v6 }
  0x5c   :  { %2643 = vmatpush3.bf16.msra.mxu0 %v2877_v6 }
  0x5d   :  { %2668 = vmatprep.subr.bf16.mxu0 %v3260_v15 }
  0xe3   :  { %v2582_v9 = vpop.f32.mrf.mxu0 }
  0xe4   :  { %v144_v28 = vadd.f32 %v2582_v9, %v2290_v24 }
  0xe5   :  { %v135_v8 = vpop.f32.mrf.mxu0 }
  0xe6   :  { %v136_v23 = vadd.f32 %v2290_v24, %v135_v8 }
  0xe7   :  { %v2583_v18 = vpop.f32.mrf.mxu0 }
  0xe8   :  { %v147_v30 = vadd.f32 %v2583_v18, %v2290_v24 }
  0xe9   :  { %v138_v19 = vpop.f32.mrf.mxu0 }
  0xea   :  { %v139_v36 = vadd.f32 %v2290_v24, %v138_v19 }
  0xef   :  { %v2588_v20 = vpop.f32.mrf.mxu0 }
  0xf0   :  { %v269_v11 = vadd.f32 %v2588_v20, %v144_v28 }
  0xf1   :  { %v252_v21 = vpop.f32.mrf.mxu0 }
  0xf2   :  { %v267_v32 = vadd.f32 %v252_v21, %v136_v23 }
  0xf3   :  { %v2589_v25 = vpop.f32.mrf.mxu0 }
  0xf4   :  { %v270_v26 = vadd.f32 %v2589_v25, %v147_v30 }
  0xf5   :  { %v255_v27 = vpop.f32.mrf.mxu0 }
  0xf6   :  { %v268_v31 = vadd.f32 %v255_v27, %v139_v36 }
  0xf7   :  { %v2594_v29 = vpop.f32.mrf.mxu0 }
  0xf8   :  { %v358_v34 = vadd.f32 %v2594_v29, %v269_v11 }
  0xf9   :  { %v341_v12 = vpop.f32.mrf.mxu0 }
  0xfa   :  { %v2600_v35 = vpop.f32.mrf.mxu1  ;;  %v356_v38 = vadd.f32 %v341_v12, %v267_v32 }
  0xfb   :  { %v2595_v37 = vpop.f32.mrf.mxu0  ;;  %v461_v41 = vadd.f32 %v2600_v35, %v358_v34 }
  0xfc   :  { %v444_v39 = vpop.f32.mrf.mxu1  ;;  %v359_v43 = vadd.f32 %v2595_v37, %v270_v26 }
  0xfd   :  { %v344_v40 = vpop.f32.mrf.mxu0  ;;  %v459_v47 = vadd.f32 %v444_v39, %v356_v38 }
  0xfe   :  { %v2601_v44 = vpop.f32.mrf.mxu1  ;;  %v357_v45 = vadd.f32 %v344_v40, %v268_v31 }
  0xff   :  { %v2606_v46 = vpop.f32.mrf.mxu0  ;;  %v462_v2 = vadd.f32 %v2601_v44, %v359_v43 }
 0x100   :  { %v548_v1 = vadd.f32 %v2606_v46, %v461_v41  ;;  %v447_v7 = vpop.f32.mrf.mxu1 }
 0x101   :  { %v531_v48 = vpop.f32.mrf.mxu0  ;;  %v460_v50 = vadd.f32 %v447_v7, %v357_v45 }
 0x102   :  { %vm552_vm14 = vcmp.ge.f32.partialorder %v548_v1, 0.0  ;;  %v556_v16 = vmul.f32 0.01, %v548_v1  ;;  %v546_v49 = vadd.f32 %v531_v48, %v459_v47 }
 0x103   :  { %v2607_v51 = vpop.f32.mrf.mxu0 }
 0x104   :  { %v560_v10 = vsel %vm552_vm14, %v548_v1, %v556_v16  ;;  %vm550_vm15 = vcmp.ge.f32.partialorder %v546_v49, 0.0  ;;  %v554_v22 = vmul.f32 0.01, %v546_v49  ;;  %v549_v52 = vadd.f32 %v2607_v51, %v462_v2  ;;  %v2876_v1 = vld [vmem:[#allocation3 + $0xb0] sm:$0xff]  }
 0x105   :  { %v2440_v53 = vpack.c.bf16 %v560_v10, %v560_v10  ;;  %v534_v54 = vpop.f32.mrf.mxu0  ;;  %vm2199_vm14 = vcmask 1041409  }
 0x106   :  { %v558_v55 = vsel %vm550_vm15, %v546_v49, %v554_v22  ;;  %vm553_vm0 = vcmp.ge.f32.partialorder %v549_v52, 0.0  ;;  %v557_v56 = vmul.f32 0.01, %v549_v52  ;;  %v547_v57 = vadd.f32 %v534_v54, %v460_v50 }
 0x107   :  { %v582_v58 = vrot.slane %v2440_v53, 7  ;;  %v2438_v59 = vpack.c.bf16 %v558_v55, %v558_v55  ;;  %vm2272_vm15 = vcmask 33792  }
 0x108   :  { %v561_v60 = vsel %vm553_vm0, %v549_v52, %v557_v56  ;;  %vm551_vm3 = vcmp.ge.f32.partialorder %v547_v57, 0.0  ;;  %v555_v61 = vmul.f32 0.01, %v547_v57 }
 0x109   :  { %596 = vst [vmem:[#allocation2 + $0xc] sm:$0xe] %v582_v58  ;;  %v577_v62 = vrot.slane %v2438_v59, 7  ;;  %v2441_v63 = vpack.c.bf16 %v561_v60, %v561_v60  ;;  %v583_v4 = vrot.slane %v582_v58, 4  ;;  %v2878_v59 = vld [vmem:[#allocation3 + $0xa8] sm:$0xff]  }
 0x10a   :  { %v559_v3 = vsel %vm551_vm3, %v547_v57, %v555_v61 }
 0x10b   :  { %593 = vst [vmem:[#allocation2] sm:$0xe] %v577_v62  ;;  %v584_v13 = vrot.slane %v2441_v63, 7  ;;  %v2439_v6 = vpack.c.bf16 %v559_v3, %v559_v3  ;;  %v578_v9 = vrot.slane %v577_v62, 4 }
 0x10d   :  { %v585_v8 = vsel %vm3266_vm4, %v583_v4, %v584_v13  ;;  %v586_v18 = vrot.slane %v584_v13, 4  ;;  %v579_v19 = vrot.slane %v2439_v6, 7 }
 0x10e   :  { %597 = vst [vmem:[#allocation2 + $0x10] sm:$0xf] %v585_v8 }
 0x10f   :  { %598 = vst [vmem:[#allocation2 + $0x14] sm:$0x1] %v586_v18  ;;  %v580_v20 = vsel %vm3266_vm4, %v578_v9, %v579_v19  ;;  %v581_v21 = vrot.slane %v579_v19, 4 }
 0x110   :  { %594 = vst [vmem:[#allocation2 + $0x4] sm:$0xf] %v580_v20  ;;  %v3274_v24 = vld [vmem:[#allocation2 + $0xc] sm:$0xf] }
 0x111   :  { %595 = vst [vmem:[#allocation2 + $0x8] sm:$0x1] %v581_v21  ;;  %v762_v25 = vshrl.u32 %v3274_v24, 16  ;;  %v765_v27 = vshll.u32 %v3274_v24, 16 }
 0x112   :  { %v3278_v28 = vld [vmem:[#allocation2] sm:$0xf] }
 0x113   :  { %v738_v29 = vshrl.u32 %v3278_v28, 16  ;;  %v741_v23 = vshll.u32 %v3278_v28, 16  ;;  %v764_v11 = vrot.slane %v762_v25, 4  ;;  %v767_v12 = vrot.slane %v765_v27, 5 }
 0x114   :  { %v2344_v48 = vrot.slane %v3278_v28, 9 }
 0x115   :  { %v3286_v30 = vld [vmem:[#allocation2 + $0x10] sm:$0xf]  ;;  %v740_v32 = vrot.slane %v738_v29, 4  ;;  %v743_v34 = vrot.slane %v741_v23, 5  ;;  %v1053_v35 = vrot.slane %v738_v29, 5  ;;  %v1054_v36 = vrot.slane %v741_v23, 6 }
 0x116   :  { %v3290_v38 = vld [vmem:[#allocation2 + $0x14] sm:$0x3]  ;;  %v768_v39 = vor.u32 %v767_v12, %v764_v11  ;;  %v771_v31 = vshll.u32 %v3286_v30, 16  ;;  %v775_v40 = vshrl.u32 %v3286_v30, 16  ;;  %v2325_v47 = vcombine.low %v3274_v24, %v3286_v30  ;;  %v2880_v23 = vld [vmem:[#allocation3 + $0xa0] sm:$0xff]  }
 0x117   :  { %v3288_v37 = vld [vmem:[#allocation2 + $0x4] sm:$0xf]  ;;  %v744_v26 = vor.u32 %v743_v34, %v740_v32  ;;  %v781_v51 = vshll.u32 %v3290_v38, 16  ;;  %v1055_v53 = vor.u32 %v1054_v36, %v1053_v35  ;;  %v2881_v35 = vld [vmem:[#allocation3 + $0xf0] sm:$0xff]  }
 0x118   :  { %v2324_v41 = vcombine.low %v3278_v28, %v3288_v37  ;;  %v3296_v43 = vld [vmem:[#allocation2 + $0x8] sm:$0x3]  ;;  %v915_v44 = vrot.slane %v3288_v37, 5  ;;  %v747_v45 = vshll.u32 %v3288_v37, 16  ;;  %v751_v46 = vshrl.u32 %v3288_v37, 16 }
 0x119   :  { %v918_v2 = vrot.slane %v3296_v43, 5  ;;  %v757_v7 = vshll.u32 %v3296_v43, 16  ;;  %v745_v10 = vrot.slane %v744_v26, 4  ;;  %v773_v22 = vrot.slane %v771_v31, 5 }
 0x11a   :  { %2624 = vmatprep.mubr.bf16.mxu1 %v2324_v41  ;;  %v917_v16 = vrot.slane %v915_v44, 4  ;;  %v749_v49 = vrot.slane %v747_v45, 5  ;;  %v753_v50 = vrot.slane %v751_v46, 4  ;;  %v777_v52 = vrot.slane %v775_v40, 4  ;;  %v2882_v41 = vld [vmem:[#allocation3 + $0x98] sm:$0xff]  }
 0x11b   :  { %2625 = vmatmul.mubr.bf16.vlgmr.msra.gmra.mxu1 %v2325_v47  ;;  %v916_v54 = vsel %vm3164_vm9, %v2344_v48, %v915_v44  ;;  %v769_v57 = vrot.slane %v768_v39, 4  ;;  %v759_v60 = vrot.slane %v757_v7, 5  ;;  %v1057_v62 = vrot.slane %v751_v46, 5  ;;  %v2883_v44 = vld [vmem:[#allocation3 + $0xe8] sm:$0xff]   ;;  %v2885_v46 = vld [vmem:[#allocation3 + $0xe0] sm:$0xff]  }
 0x11c   :  { %2649 = vmatpush3.bf16.msra.mxu1 %v3257_v5  ;;  %v919_v55 = vsel %vm3164_vm9, %v917_v16, %v918_v2  ;;  %v754_v56 = vor.u32 %v753_v50, %v749_v49  ;;  %v778_v61 = vor.u32 %v777_v52, %v773_v22  ;;  %v1058_v3 = vrot.slane %v747_v45, 6  ;;  %v2884_v45 = vld [vmem:[#allocation3 + $0x90] sm:$0xff]   ;;  %v2886_v47 = vld [vmem:[#allocation3 + $0x88] sm:$0xff]   ;;  %v2888_v2 = vld [vmem:[#allocation3 + $0x80] sm:$0xff]  }
 0x11d   :  { %2650 = vmatprep.subr.bf16.mxu1 %v2876_v1  ;;  %v2346_v58 = vcombine.low %v916_v54, %v919_v55  ;;  %v1062_v4 = vshrl.u32 %v3296_v43, 16  ;;  %v1065_v13 = vrot.slane %v757_v7, 6  ;;  %v783_v6 = vrot.slane %v781_v51, 5  ;;  %v2889_v7 = vld [vmem:[#allocation3 + $0xd0] sm:$0xff]   ;;  %v2890_v54 = vld [vmem:[#allocation3 + $0x138] sm:$0xff]  }
 0x11e   :  { %v755_v63 = vrot.slane %v754_v56, 4  ;;  %v779_v5 = vrot.slane %v778_v61, 4  ;;  %v750_v9 = vsel %vm3150_vm8, %v745_v10, %v749_v49  ;;  %v1059_v18 = vor.u32 %v1058_v3, %v1057_v62  ;;  %v2892_v62 = vld [vmem:[#allocation3 + $0x130] sm:$0xff]  }
 0x11f   :  { %2664 = vmatprep.mubr.bf16.mxu1 %v2346_v58  ;;  %v1064_v19 = vrot.slane %v1062_v4, 5  ;;  %v774_v21 = vsel %vm3150_vm8, %v769_v57, %v773_v22  ;;  %v1056_v12 = vrot.slane %v1055_v53, 4  ;;  %v1211_v48 = vrot.slane %v3288_v37, 6 }
 0x120   :  { %2651 = vmatpush3.bf16.msra.mxu1 %v2876_v1  ;;  %v760_v8 = vsel %vm3150_vm8, %v755_v63, %v759_v60  ;;  %v784_v29 = vsel %vm3150_vm8, %v779_v5, %v783_v6  ;;  %v1061_v32 = vrot.slane %v1059_v18, 4  ;;  %v2887_v1 = vld [vmem:[#allocation3 + $0xd8] sm:$0xff]   ;;  %v925_v49 = vrot.slane %v3290_v38, 5  ;;  %v2893_v63 = vld [vmem:[#allocation3 + $0xc0] sm:$0xff]  }
 0x121   :  { %2652 = vmatprep.subr.bf16.mxu1 %v2878_v59  ;;  %v2334_v20 = vcombine.low %v750_v9, %v760_v8  ;;  %v2335_v11 = vcombine.low %v774_v21, %v784_v29  ;;  %v1066_v34 = vor.u32 %v1065_v13, %v1064_v19  ;;  %v1060_v36 = vsel %vm3206_vm12, %v1056_v12, %v1059_v18  ;;  %v2895_v8 = vld [vmem:[#allocation3 + $0x120] sm:$0xff]   ;;  %v2896_v19 = vld [vmem:[#allocation3 + $0x118] sm:$0xff]   ;;  %v2898_v21 = vld [vmem:[#allocation3 + $0x108] sm:$0xff]  }
 0x122   :  { %v1214_v50 = vrot.slane %v3296_v43, 6  ;;  %v1213_v10 = vrot.slane %v1211_v48, 4  ;;  %v1072_v22 = vrot.slane %v775_v40, 5  ;;  %v1073_v52 = vrot.slane %v771_v31, 6  ;;  %v2891_v43 = vld [vmem:[#allocation3 + $0xc8] sm:$0xff]  }
 0x123   :  { %2644 = vmatprep.mubr.bf16.mxu0 %v2334_v20  ;;  %v1067_v26 = vsel %vm3206_vm12, %v1061_v32, %v1066_v34  ;;  %v1077_v37 = vshrl.u32 %v3290_v38, 16  ;;  %v2345_v53 = vrot.slane %v3274_v24, 9  ;;  %v2366_v56 = vrot.slane %v3278_v28, 10  ;;  %v2897_v20 = vld [vmem:[#allocation3 + $0x110] sm:$0xff]  }
 0x124   :  { %2653 = vmatpush3.bf16.msra.mxu1 %v2878_v59  ;;  %2645 = vmatmul.mubr.bf16.vlgmr.msra.gmra.mxu0 %v2335_v11  ;;  %v2356_v39 = vcombine.low %v1060_v36, %v1067_v26  ;;  %v1068_v40 = vrot.slane %v762_v25, 5  ;;  %v1069_v31 = vrot.slane %v765_v27, 6  ;;  %v1215_v57 = vsel %vm3228_vm13, %v1213_v10, %v1214_v50  ;;  %v2901_v26 = vld [vmem:[#allocation6 + $0x30] sm:$0xff]   ;;  %v3371_v50 = vld [vmem:[#allocation6 + $0xf8] sm:$0xff]  }
 0x125   :  { %2669 = vmatpush3.bf16.msra.mxu0 %v3260_v15  ;;  %2654 = vmatprep.subr.bf16.mxu1 %v2880_v23  ;;  %v922_v15 = vrot.slane %v3286_v30, 5  ;;  %v1074_v58 = vor.u32 %v1073_v52, %v1072_v22  ;;  %v1079_v59 = vrot.slane %v1077_v37, 5  ;;  %v1080_v60 = vrot.slane %v781_v51, 6  ;;  %v2894_v51 = vld [vmem:[#allocation3 + $0x128] sm:$0xff]  }
 0x126   :  { %2670 = vmatprep.subr.bf16.mxu0 %v2881_v35  ;;  %2684 = vmatprep.mubr.bf16.mxu0 %v2356_v39  ;;  %v1212_v25 = vsel %vm3228_vm13, %v2366_v56, %v1211_v48  ;;  %v1070_v3 = vor.u32 %v1069_v31, %v1068_v40  ;;  %v1218_v29 = vrot.slane %v3286_v30, 6  ;;  %v1221_v12 = vrot.slane %v3290_v38, 6  ;;  %v2900_v30 = vld [vmem:[#allocation6 + $0x38] sm:$0xff]   ;;  %v2902_v38 = vld [vmem:[#allocation6 + $0x28] sm:$0xff]   ;;  %v2912_v48 = vld [vmem:[#allocation6] sm:$0xff]  }
 0x127   :  { %v924_v16 = vrot.slane %v922_v15, 4  ;;  %v923_v61 = vsel %vm3164_vm9, %v2345_v53, %v922_v15  ;;  %v2368_v27 = vcombine.low %v1212_v25, %v1215_v57  ;;  %v1076_v4 = vrot.slane %v1074_v58, 4  ;;  %v2903_v39 = vld [vmem:[#allocation6 + $0x78] sm:$0xff]   ;;  %v2323_v31 = vld [vmem:[%s3536_s4] ss:$0 sm:$0xff] }
 0x128   :  { %2655 = vmatpush3.bf16.msra.mxu1 %v2880_v23  ;;  %v1081_v13 = vor.u32 %v1080_v60, %v1079_v59  ;;  %v1071_v5 = vrot.slane %v1070_v3, 4  ;;  %v2899_v23 = vld [vmem:[#allocation3 + $0x100] sm:$0xff]   ;;  %v1220_v11 = vrot.slane %v1218_v29, 4  ;;  %v2367_v32 = vrot.slane %v3274_v24, 10  ;;  %v2911_v15 = vld [vmem:[#allocation6 + $0x58] sm:$0xff]  }
 0x129   :  { %2671 = vmatpush3.bf16.msra.mxu0 %v2881_v35  ;;  %2656 = vmatprep.subr.bf16.mxu1 %v2882_v41  ;;  %v926_v55 = vsel %vm3164_vm9, %v924_v16, %v925_v49  ;;  %v2904_v24 = vld [vmem:[#allocation6 + $0x20] sm:$0xff]   ;;  %v2917_v16 = vld [vmem:[#allocation6 + $0x48] sm:$0xff]  }
 0x12a   :  { %2672 = vmatprep.subr.bf16.mxu0 %v2883_v44  ;;  %v2347_v28 = vcombine.low %v923_v61, %v926_v55  ;;  %v1082_v6 = vsel %vm3206_vm12, %v1076_v4, %v1081_v13  ;;  %v1075_v9 = vsel %vm3206_vm12, %v1071_v5, %v1074_v58  ;;  %v1222_v34 = vsel %vm3228_vm13, %v1220_v11, %v1221_v12  ;;  %v2919_v49 = vld [vmem:[#allocation6 + $0x40] sm:$0xff]  }
 0x12b   :  { %v2357_v18 = vcombine.low %v1075_v9, %v1082_v6  ;;  %v1219_v35 = vsel %vm3228_vm13, %v2367_v32, %v1218_v29 }
 0x12c   :  { %2657 = vmatpush3.bf16.msra.mxu1 %v2882_v41  ;;  %v2369_v36 = vcombine.low %v1219_v35, %v1222_v34  ;;  %v2905_v41 = vld [vmem:[#allocation6 + $0x70] sm:$0xff]  }
 0x12d   :  { %2673 = vmatpush3.bf16.msra.mxu0 %v2883_v44  ;;  %2658 = vmatprep.subr.bf16.mxu1 %v2884_v45  ;;  %v2906_v44 = vld [vmem:[#allocation6 + $0x18] sm:$0xff]  }
 0x12e   :  { %2674 = vmatprep.subr.bf16.mxu0 %v2885_v46 }
 0x130   :  { %2659 = vmatpush3.bf16.msra.mxu1 %v2884_v45  ;;  %v2907_v45 = vld [vmem:[#allocation6 + $0x68] sm:$0xff]  }
 0x131   :  { %2675 = vmatpush3.bf16.msra.mxu0 %v2885_v46  ;;  %2660 = vmatprep.subr.bf16.mxu1 %v2886_v47  ;;  %v2908_v46 = vld [vmem:[#allocation6 + $0x10] sm:$0xff]  }
 0x132   :  { %2676 = vmatprep.subr.bf16.mxu0 %v2887_v1 }
 0x134   :  { %2661 = vmatpush3.bf16.msra.mxu1 %v2886_v47  ;;  %v2909_v47 = vld [vmem:[#allocation6 + $0x60] sm:$0xff]  }
 0x135   :  { %2677 = vmatpush3.bf16.msra.mxu0 %v2887_v1  ;;  %2662 = vmatprep.subr.bf16.mxu1 %v2888_v2  ;;  %v2910_v1 = vld [vmem:[#allocation6 + $0x8] sm:$0xff]  }
 0x136   :  { %2678 = vmatprep.subr.bf16.mxu0 %v2889_v7 }
 0x138   :  { %2663 = vmatpush3.bf16.msra.mxu1 %v2888_v2  ;;  %v2913_v2 = vld [vmem:[#allocation6 + $0x50] sm:$0xff]  }
 0x139   :  { %2679 = vmatpush3.bf16.msra.mxu0 %v2889_v7  ;;  %2688 = vmatprep.subr.bf16.mxu1 %v2890_v54  ;;  %v3368_v7 = vld [vmem:[#allocation6 + $0xb8] sm:$0xff]  }
 0x13a   :  { %2680 = vmatprep.subr.bf16.mxu0 %v2891_v43 }
 0x13b   :  { %2665 = vmatmul.mubr.bf16.vlgmr.msra.gmra.mxu1 %v2347_v28 }
 0x13c   :  { %2689 = vmatpush3.bf16.msra.mxu1 %v2890_v54  ;;  %2704 = vmatprep.mubr.bf16.mxu1 %v2368_v27 }
 0x13d   :  { %2681 = vmatpush3.bf16.msra.mxu0 %v2891_v43  ;;  %2690 = vmatprep.subr.bf16.mxu1 %v2892_v62 }
 0x13e   :  { %2682 = vmatprep.subr.bf16.mxu0 %v2893_v63 }
 0x140   :  { %2691 = vmatpush3.bf16.msra.mxu1 %v2892_v62 }
 0x141   :  { %2683 = vmatpush3.bf16.msra.mxu0 %v2893_v63  ;;  %2692 = vmatprep.subr.bf16.mxu1 %v2894_v51 }
 0x142   :  { %2708 = vmatprep.subr.bf16.mxu0 %v2900_v30 }
 0x144   :  { %2685 = vmatmul.mubr.bf16.vlgmr.msra.gmra.mxu0 %v2357_v18  ;;  %2693 = vmatpush3.bf16.msra.mxu1 %v2894_v51 }
 0x145   :  { %2694 = vmatprep.subr.bf16.mxu1 %v2895_v8  ;;  %2709 = vmatpush3.bf16.msra.mxu0 %v2900_v30 }
 0x146   :  { %2710 = vmatprep.subr.bf16.mxu0 %v2901_v26 }
 0x148   :  { %2695 = vmatpush3.bf16.msra.mxu1 %v2895_v8 }
 0x149   :  { %2696 = vmatprep.subr.bf16.mxu1 %v2896_v19  ;;  %2711 = vmatpush3.bf16.msra.mxu0 %v2901_v26 }
 0x14a   :  { %2712 = vmatprep.subr.bf16.mxu0 %v2902_v38 }
 0x14c   :  { %2697 = vmatpush3.bf16.msra.mxu1 %v2896_v19 }
 0x14d   :  { %2698 = vmatprep.subr.bf16.mxu1 %v2897_v20  ;;  %2713 = vmatpush3.bf16.msra.mxu0 %v2902_v38 }
 0x14e   :  { %2714 = vmatprep.subr.bf16.mxu0 %v2904_v24 }
 0x150   :  { %2699 = vmatpush3.bf16.msra.mxu1 %v2897_v20 }
 0x151   :  { %2700 = vmatprep.subr.bf16.mxu1 %v2898_v21  ;;  %2715 = vmatpush3.bf16.msra.mxu0 %v2904_v24 }
 0x152   :  { %2716 = vmatprep.subr.bf16.mxu0 %v2906_v44 }
 0x154   :  { %2701 = vmatpush3.bf16.msra.mxu1 %v2898_v21 }
 0x155   :  { %2702 = vmatprep.subr.bf16.mxu1 %v2899_v23  ;;  %2717 = vmatpush3.bf16.msra.mxu0 %v2906_v44 }
 0x156   :  { %2718 = vmatprep.subr.bf16.mxu0 %v2908_v46 }
 0x158   :  { %2703 = vmatpush3.bf16.msra.mxu1 %v2899_v23 }
 0x159   :  { %2728 = vmatprep.subr.bf16.mxu1 %v2903_v39  ;;  %2719 = vmatpush3.bf16.msra.mxu0 %v2908_v46 }
 0x15a   :  { %2720 = vmatprep.subr.bf16.mxu0 %v2910_v1 }
 0x15b   :  { %2705 = vmatmul.mubr.bf16.vlgmr.msra.gmra.mxu1 %v2369_v36 }
 0x15c   :  { %2729 = vmatpush3.bf16.msra.mxu1 %v2903_v39 }
 0x15d   :  { %2730 = vmatprep.subr.bf16.mxu1 %v2905_v41  ;;  %2721 = vmatpush3.bf16.msra.mxu0 %v2910_v1 }
 0x15e   :  { %2722 = vmatprep.subr.bf16.mxu0 %v2912_v48 }
 0x160   :  { %2731 = vmatpush3.bf16.msra.mxu1 %v2905_v41 }
 0x161   :  { %2732 = vmatprep.subr.bf16.mxu1 %v2907_v45  ;;  %2723 = vmatpush3.bf16.msra.mxu0 %v2912_v48 }
 0x162   :  { %2748 = vmatprep.subr.bf16.mxu0 %v3368_v7 }
 0x164   :  { %2733 = vmatpush3.bf16.msra.mxu1 %v2907_v45 }
 0x165   :  { %2734 = vmatprep.subr.bf16.mxu1 %v2909_v47 }
 0x168   :  { %2735 = vmatpush3.bf16.msra.mxu1 %v2909_v47 }
 0x169   :  { %2736 = vmatprep.subr.bf16.mxu1 %v2911_v15 }
 0x16c   :  { %2737 = vmatpush3.bf16.msra.mxu1 %v2911_v15 }
 0x16d   :  { %2738 = vmatprep.subr.bf16.mxu1 %v2913_v2 }
 0x170   :  { %2739 = vmatpush3.bf16.msra.mxu1 %v2913_v2 }
 0x171   :  { %2740 = vmatprep.subr.bf16.mxu1 %v2917_v16 }
 0x174   :  { %2741 = vmatpush3.bf16.msra.mxu1 %v2917_v16 }
 0x175   :  { %2742 = vmatprep.subr.bf16.mxu1 %v2919_v49 }
 0x178   :  { %2743 = vmatpush3.bf16.msra.mxu1 %v2919_v49 }
 0x179   :  { %2768 = vmatprep.subr.bf16.mxu1 %v3371_v50 }
 0x1db   :  { %v2626_v10 = vpop.f32.mrf.mxu1 }
 0x1dc   :  { %v731_v58 = vadd.f32 %v2626_v10, %v2323_v31 }
 0x1dd   :  { %v722_v52 = vpop.f32.mrf.mxu1 }
 0x1de   :  { %v723_v61 = vadd.f32 %v2323_v31, %v722_v52 }
 0x1df   :  { %v2627_v53 = vpop.f32.mrf.mxu1 }
 0x1e0   :  { %v734_v25 = vadd.f32 %v2627_v53, %v2323_v31 }
 0x1e1   :  { %v725_v55 = vpop.f32.mrf.mxu1 }
 0x1e2   :  { %v726_v3 = vadd.f32 %v2323_v31, %v725_v55 }
 0x1e4   :  { %v2646_v22 = vpop.f32.mrf.mxu0 }
 0x1e5   :  { %v909_v28 = vadd.f32 %v2646_v22, %v731_v58 }
 0x1e6   :  { %v892_v37 = vpop.f32.mrf.mxu0 }
 0x1e7   :  { %v907_v62 = vadd.f32 %v892_v37, %v723_v61 }
 0x1e8   :  { %v2647_v54 = vpop.f32.mrf.mxu0 }
 0x1e9   :  { %v910_v13 = vadd.f32 %v2647_v54, %v734_v25 }
 0x1ea   :  { %v895_v56 = vpop.f32.mrf.mxu0 }
 0x1eb   :  { %v908_v6 = vadd.f32 %v895_v56, %v726_v3 }
 0x1fb   :  { %v2666_v43 = vpop.f32.mrf.mxu1 }
 0x1fc   :  { %v1051_v27 = vadd.f32 %v2666_v43, %v909_v28 }
 0x1fd   :  { %v1034_v57 = vpop.f32.mrf.mxu1 }
 0x1fe   :  { %v1049_v51 = vadd.f32 %v1034_v57, %v907_v62 }
 0x1ff   :  { %v2667_v60 = vpop.f32.mrf.mxu1 }
 0x200   :  { %v1052_v8 = vadd.f32 %v2667_v60, %v910_v13 }
 0x201   :  { %v1037_v4 = vpop.f32.mrf.mxu1 }
 0x202   :  { %v1050_v21 = vadd.f32 %v1037_v4, %v908_v6 }
 0x204   :  { %v2686_v40 = vpop.f32.mrf.mxu0 }
 0x205   :  { %v1207_v5 = vadd.f32 %v2686_v40, %v1051_v27 }
 0x206   :  { %v1190_v59 = vpop.f32.mrf.mxu0 }
 0x207   :  { %v1205_v18 = vadd.f32 %v1190_v59, %v1049_v51 }
 0x208   :  { %v2687_v63 = vpop.f32.mrf.mxu0 }
 0x209   :  { %v1208_v23 = vadd.f32 %v2687_v63, %v1052_v8 }
 0x20a   :  { %v1193_v19 = vpop.f32.mrf.mxu0 }
 0x20b   :  { %v1206_v32 = vadd.f32 %v1193_v19, %v1050_v21  ;;  %v2918_v19 = vld [vmem:[#allocation6 + $0xb0] sm:$0xff]  }
 0x21b   :  { %v2706_v9 = vpop.f32.mrf.mxu1 }
 0x21c   :  { %v1347_v20 = vadd.f32 %v2706_v9, %v1207_v5 }
 0x21d   :  { %v1330_v29 = vpop.f32.mrf.mxu1 }
 0x21e   :  { %vm1351_vm5 = vcmp.ge.f32.partialorder %v1347_v20, 0.0  ;;  %v1355_v11 = vmul.f32 0.01, %v1347_v20  ;;  %v1345_v12 = vadd.f32 %v1330_v29, %v1205_v18 }
 0x21f   :  { %v2707_v34 = vpop.f32.mrf.mxu1 }
 0x220   :  { %v1359_v35 = vsel %vm1351_vm5, %v1347_v20, %v1355_v11  ;;  %vm1349_vm6 = vcmp.ge.f32.partialorder %v1345_v12, 0.0  ;;  %v1353_v36 = vmul.f32 0.01, %v1345_v12  ;;  %v1348_v30 = vadd.f32 %v2707_v34, %v1208_v23 }
 0x221   :  { %v2444_v26 = vpack.c.bf16 %v1359_v35, %v1359_v35  ;;  %v1333_v38 = vpop.f32.mrf.mxu1 }
 0x222   :  { %v1357_v39 = vsel %vm1349_vm6, %v1345_v12, %v1353_v36  ;;  %vm1352_vm7 = vcmp.ge.f32.partialorder %v1348_v30, 0.0  ;;  %v1356_v24 = vmul.f32 0.01, %v1348_v30  ;;  %v1346_v41 = vadd.f32 %v1333_v38, %v1206_v32 }
 0x223   :  { %v1378_v44 = vrot.slane %v2444_v26, 7  ;;  %v2442_v45 = vpack.c.bf16 %v1357_v39, %v1357_v39 }
 0x224   :  { %v1360_v46 = vsel %vm1352_vm7, %v1348_v30, %v1356_v24  ;;  %vm1350_vm10 = vcmp.ge.f32.partialorder %v1346_v41, 0.0  ;;  %v1354_v47 = vmul.f32 0.01, %v1346_v41 }
 0x225   :  { %1392 = vst [vmem:[#allocation2 + $0xc] sm:$0xe] %v1378_v44  ;;  %v1373_v1 = vrot.slane %v2442_v45, 7  ;;  %v2445_v15 = vpack.c.bf16 %v1360_v46, %v1360_v46  ;;  %v1379_v2 = vrot.slane %v1378_v44, 4  ;;  %v2920_v44 = vld [vmem:[#allocation6 + $0xa8] sm:$0xff]  }
 0x226   :  { %v1358_v48 = vsel %vm1350_vm10, %v1346_v41, %v1354_v47 }
 0x227   :  { %1389 = vst [vmem:[#allocation2] sm:$0xe] %v1373_v1  ;;  %v1380_v16 = vrot.slane %v2445_v15, 7  ;;  %v2443_v49 = vpack.c.bf16 %v1358_v48, %v1358_v48  ;;  %v1374_v10 = vrot.slane %v1373_v1, 4 }
 0x229   :  { %v1381_v22 = vsel %vm3266_vm4, %v1379_v2, %v1380_v16  ;;  %v1382_v52 = vrot.slane %v1380_v16, 4  ;;  %v1375_v37 = vrot.slane %v2443_v49, 7 }
 0x22a   :  { %1393 = vst [vmem:[#allocation2 + $0x10] sm:$0xf] %v1381_v22 }
 0x22b   :  { %1394 = vst [vmem:[#allocation2 + $0x14] sm:$0x1] %v1382_v52  ;;  %v1376_v53 = vsel %vm3266_vm4, %v1374_v10, %v1375_v37  ;;  %v1377_v54 = vrot.slane %v1375_v37, 4 }
 0x22c   :  { %1390 = vst [vmem:[#allocation2 + $0x4] sm:$0xf] %v1376_v53  ;;  %v3381_v55 = vld [vmem:[#allocation2 + $0xc] sm:$0xf] }
 0x22d   :  { %1391 = vst [vmem:[#allocation2 + $0x8] sm:$0x1] %v1377_v54  ;;  %v1558_v43 = vshrl.u32 %v3381_v55, 16  ;;  %v1561_v56 = vshll.u32 %v3381_v55, 16 }
 0x22e   :  { %v3385_v40 = vld [vmem:[#allocation2] sm:$0xf] }
 0x22f   :  { %v1534_v31 = vshrl.u32 %v3385_v40, 16  ;;  %v1537_v57 = vshll.u32 %v3385_v40, 16  ;;  %v1560_v58 = vrot.slane %v1558_v43, 4  ;;  %v1563_v0 = vrot.slane %v1561_v56, 5 }
 0x230   :  { %v2403_v20 = vrot.slane %v3385_v40, 9 }
 0x231   :  { %v3393_v59 = vld [vmem:[#allocation2 + $0x10] sm:$0xf]  ;;  %v1536_v60 = vrot.slane %v1534_v31, 4  ;;  %v1539_v61 = vrot.slane %v1537_v57, 5  ;;  %v1849_v28 = vrot.slane %v1534_v31, 5  ;;  %v1850_v25 = vrot.slane %v1537_v57, 6 }
 0x232   :  { %v3397_v63 = vld [vmem:[#allocation2 + $0x14] sm:$0x3]  ;;  %v1564_v3 = vor.u32 %v1563_v0, %v1560_v58  ;;  %v1567_v4 = vshll.u32 %v3393_v59, 16  ;;  %v1571_v13 = vshrl.u32 %v3393_v59, 16  ;;  %v2384_v18 = vcombine.low %v3381_v55, %v3393_v59  ;;  %v2922_v31 = vld [vmem:[#allocation6 + $0xa0] sm:$0xff]  }
 0x233   :  { %v3395_v62 = vld [vmem:[#allocation2 + $0x4] sm:$0xf]  ;;  %v1540_v27 = vor.u32 %v1539_v61, %v1536_v60  ;;  %v1577_v32 = vshll.u32 %v3397_v63, 16  ;;  %v1851_v30 = vor.u32 %v1850_v25, %v1849_v28  ;;  %v2923_v61 = vld [vmem:[#allocation6 + $0xf0] sm:$0xff]   ;;  %v2017_v17 = vrot.slane %v3397_v63, 6 }
 0x234   :  { %v2383_v51 = vcombine.low %v3385_v40, %v3395_v62  ;;  %v3403_v5 = vld [vmem:[#allocation2 + $0x8] sm:$0x3]  ;;  %v1711_v6 = vrot.slane %v3395_v62, 5  ;;  %v1543_v9 = vshll.u32 %v3395_v62, 16  ;;  %v1547_v8 = vshrl.u32 %v3395_v62, 16 }
 0x235   :  { %v1714_v21 = vrot.slane %v3403_v5, 5  ;;  %v1553_v29 = vshll.u32 %v3403_v5, 16  ;;  %v1541_v34 = vrot.slane %v1540_v27, 4  ;;  %v1569_v35 = vrot.slane %v1567_v4, 5 }
 0x236   :  { %2724 = vmatprep.mubr.bf16.mxu0 %v2383_v51  ;;  %v1713_v23 = vrot.slane %v1711_v6, 4  ;;  %v1545_v11 = vrot.slane %v1543_v9, 5  ;;  %v1549_v12 = vrot.slane %v1547_v8, 4  ;;  %v1573_v36 = vrot.slane %v1571_v13, 4  ;;  %v2926_v51 = vld [vmem:[#allocation6 + $0x90] sm:$0xff]  }
 0x237   :  { %2725 = vmatmul.mubr.bf16.vlgmr.msra.gmra.mxu0 %v2384_v18  ;;  %v1712_v26 = vsel %vm3164_vm9, %v2403_v20, %v1711_v6  ;;  %v1565_v24 = vrot.slane %v1564_v3, 4  ;;  %v1555_v45 = vrot.slane %v1553_v29, 5  ;;  %v1853_v47 = vrot.slane %v1547_v8, 5  ;;  %v2925_v3 = vld [vmem:[#allocation6 + $0xe8] sm:$0xff]   ;;  %v2927_v6 = vld [vmem:[#allocation6 + $0xe0] sm:$0xff]   ;;  %v2929_v8 = vld [vmem:[#allocation6 + $0xd8] sm:$0xff]  }
 0x238   :  { %2749 = vmatpush3.bf16.msra.mxu0 %v3368_v7  ;;  %v1715_v38 = vsel %vm3164_vm9, %v1713_v23, %v1714_v21  ;;  %v1550_v39 = vor.u32 %v1549_v12, %v1545_v11  ;;  %v1574_v46 = vor.u32 %v1573_v36, %v1569_v35  ;;  %v1854_v15 = vrot.slane %v1543_v9, 6  ;;  %v2928_v9 = vld [vmem:[#allocation6 + $0x88] sm:$0xff]   ;;  %v2931_v20 = vld [vmem:[#allocation6 + $0xd0] sm:$0xff]   ;;  %v2932_v36 = vld [vmem:[#allocation6 + $0x138] sm:$0xff]  }
 0x239   :  { %2750 = vmatprep.subr.bf16.mxu0 %v2918_v19  ;;  %v2405_v41 = vcombine.low %v1712_v26, %v1715_v38  ;;  %v1858_v48 = vshrl.u32 %v3403_v5, 16  ;;  %v1861_v2 = vrot.slane %v1553_v29, 6  ;;  %v1579_v16 = vrot.slane %v1577_v32, 5 }
 0x23a   :  { %v1551_v1 = vrot.slane %v1550_v39, 4  ;;  %v1575_v7 = vrot.slane %v1574_v46, 4  ;;  %v1546_v49 = vsel %vm3150_vm8, %v1541_v34, %v1545_v11  ;;  %v1855_v22 = vor.u32 %v1854_v15, %v1853_v47  ;;  %v2935_v46 = vld [vmem:[#allocation6 + $0xc0] sm:$0xff]  }
 0x23b   :  { %2764 = vmatprep.mubr.bf16.mxu0 %v2405_v41  ;;  %v1860_v52 = vrot.slane %v1858_v48, 5  ;;  %v1570_v53 = vsel %vm3150_vm8, %v1565_v24, %v1569_v35  ;;  %v1852_v58 = vrot.slane %v1851_v30, 4  ;;  %v2007_v18 = vrot.slane %v3395_v62, 6 }
 0x23c   :  { %2751 = vmatpush3.bf16.msra.mxu0 %v2918_v19  ;;  %v1556_v10 = vsel %vm3150_vm8, %v1551_v1, %v1555_v45  ;;  %v1580_v54 = vsel %vm3150_vm8, %v1575_v7, %v1579_v16  ;;  %v1857_v0 = vrot.slane %v1855_v22, 4  ;;  %v2930_v19 = vld [vmem:[#allocation6 + $0x80] sm:$0xff]   ;;  %v1721_v29 = vrot.slane %v3397_v63, 5  ;;  %v2934_v45 = vld [vmem:[#allocation6 + $0x130] sm:$0xff]  }
 0x23d   :  { %2752 = vmatprep.subr.bf16.mxu0 %v2920_v44  ;;  %v2393_v37 = vcombine.low %v1546_v49, %v1556_v10  ;;  %v2394_v57 = vcombine.low %v1570_v53, %v1580_v54  ;;  %v1862_v60 = vor.u32 %v1861_v2, %v1860_v52  ;;  %v1856_v28 = vsel %vm3206_vm12, %v1852_v58, %v1855_v22  ;;  %v2937_v7 = vld [vmem:[#allocation6 + $0x120] sm:$0xff]   ;;  %v2938_v49 = vld [vmem:[#allocation6 + $0x118] sm:$0xff]   ;;  %v2939_v10 = vld [vmem:[#allocation6 + $0x110] sm:$0xff]  }
 0x23e   :  { %v2010_v23 = vrot.slane %v3403_v5, 6  ;;  %v2009_v11 = vrot.slane %v2007_v18, 4  ;;  %v1868_v12 = vrot.slane %v1571_v13, 5  ;;  %v1869_v34 = vrot.slane %v1567_v4, 6  ;;  %v2933_v5 = vld [vmem:[#allocation6 + $0xc8] sm:$0xff]  }
 0x23f   :  { %2744 = vmatprep.mubr.bf16.mxu1 %v2393_v37  ;;  %v1863_v25 = vsel %vm3206_vm12, %v1857_v0, %v1862_v60  ;;  %v1873_v62 = vshrl.u32 %v3397_v63, 16  ;;  %v2404_v35 = vrot.slane %v3381_v55, 9  ;;  %v2425_v26 = vrot.slane %v3385_v40, 10  ;;  %v2940_v22 = vld [vmem:[#allocation6 + $0x108] sm:$0xff]   ;;  %v2941_v37 = vld [vmem:[#allocation6 + $0x100] sm:$0xff]  }
 0x240   :  { %2753 = vmatpush3.bf16.msra.mxu0 %v2920_v44  ;;  %2745 = vmatmul.mubr.bf16.vlgmr.msra.gmra.mxu1 %v2394_v57  ;;  %v2415_v27 = vcombine.low %v1856_v28, %v1863_v25  ;;  %v1864_v13 = vrot.slane %v1558_v43, 5  ;;  %v1865_v4 = vrot.slane %v1561_v56, 6  ;;  %v2011_v38 = vsel %vm3228_vm13, %v2009_v11, %v2010_v23  ;;  %v2186_v63 = vld [vmem:[%s3539_s7 + $0x60] sm:$0xff]  ;;  %v2185_v60 = vld [vmem:[%s3539_s7 + $0x58] sm:$0xff]  ;;  %v2183_v28 = vld [vmem:[%s3539_s7 + $0x48] sm:$0xff] }
 0x241   :  { %2769 = vmatpush3.bf16.msra.mxu1 %v3371_v50  ;;  %2754 = vmatprep.subr.bf16.mxu0 %v2922_v31  ;;  %v1718_v50 = vrot.slane %v3393_v59, 5  ;;  %v1870_v39 = vor.u32 %v1869_v34, %v1868_v12  ;;  %v1875_v24 = vrot.slane %v1873_v62, 5  ;;  %v1876_v41 = vrot.slane %v1577_v32, 6  ;;  %v2182_v25 = vld [vmem:[%s3539_s7 + $0x40] sm:$0xff] }
 0x242   :  { %2770 = vmatprep.subr.bf16.mxu1 %v2923_v61  ;;  %2784 = vmatprep.mubr.bf16.mxu1 %v2415_v27  ;;  %v2008_v43 = vsel %vm3228_vm13, %v2425_v26, %v2007_v18  ;;  %v1866_v47 = vor.u32 %v1865_v4, %v1864_v13  ;;  %v2014_v52 = vrot.slane %v3393_v59, 6  ;;  %v2426_v54 = vrot.slane %v3381_v55, 10  ;;  %v2189_v59 = vld [vmem:[%s3539_s7 + $0x78] sm:$0xff]  ;;  %v2188_v55 = vld [vmem:[%s3539_s7 + $0x70] sm:$0xff]  ;;  %v2382_v62 = vld [vmem:[%s3538_s6] ss:$0 sm:$0xff] }
 0x243   :  { %v1720_v21 = vrot.slane %v1718_v50, 4  ;;  %v1719_v44 = vsel %vm3164_vm9, %v2404_v35, %v1718_v50  ;;  %v2427_v56 = vcombine.low %v2008_v43, %v2011_v38  ;;  %v1872_v1 = vrot.slane %v1870_v39, 4  ;;  %v2181_v27 = vld [vmem:[%s3539_s7 + $0x38] sm:$0xff]  ;;  %v2174_v50 = vld [vmem:[%s3539_s7] sm:$0xff] }
 0x244   :  { %2755 = vmatpush3.bf16.msra.mxu0 %v2922_v31  ;;  %v1877_v15 = vor.u32 %v1876_v41, %v1875_v24  ;;  %v1867_v32 = vrot.slane %v1866_v47, 4  ;;  %v2016_v53 = vrot.slane %v2014_v52, 4  ;;  %v2015_v57 = vsel %vm3228_vm13, %v2426_v54, %v2014_v52 }
 0x245   :  { %2771 = vmatpush3.bf16.msra.mxu1 %v2923_v61  ;;  %2756 = vmatprep.subr.bf16.mxu0 %v2924_v33  ;;  %v1722_v30 = vsel %vm3164_vm9, %v1720_v21, %v1721_v29  ;;  %v3013_v0 = vmov 0.0   ;;  %v2184_v61 = vld [vmem:[%s3539_s7 + $0x50] sm:$0xff]  ;;  %vm3014_vm8 = vmmov 0  }
 0x246   :  { %2772 = vmatprep.subr.bf16.mxu1 %v2925_v3  ;;  %v2406_v40 = vcombine.low %v1719_v44, %v1722_v30  ;;  %v1878_v48 = vsel %vm3206_vm12, %v1872_v1, %v1877_v15  ;;  %v1871_v2 = vsel %vm3206_vm12, %v1867_v32, %v1870_v39  ;;  %v2018_v31 = vsel %vm3228_vm13, %v2016_v53, %v2017_v17 }
 0x247   :  { %v2416_v16 = vcombine.low %v1871_v2, %v1878_v48  ;;  %v2428_v58 = vcombine.low %v2015_v57, %v2018_v31 }
 0x248   :  { %2757 = vmatpush3.bf16.msra.mxu0 %v2924_v33  ;;  %v2180_v33 = vld [vmem:[%s3539_s7 + $0x30] sm:$0xff] }
 0x249   :  { %2773 = vmatpush3.bf16.msra.mxu1 %v2925_v3  ;;  %2758 = vmatprep.subr.bf16.mxu0 %v2926_v51  ;;  %v2179_v3 = vld [vmem:[%s3539_s7 + $0x28] sm:$0xff] }
 0x24a   :  { %2774 = vmatprep.subr.bf16.mxu1 %v2927_v6 }
 0x24c   :  { %2759 = vmatpush3.bf16.msra.mxu0 %v2926_v51  ;;  %v2178_v51 = vld [vmem:[%s3539_s7 + $0x20] sm:$0xff] }
 0x24d   :  { %2775 = vmatpush3.bf16.msra.mxu1 %v2927_v6  ;;  %2760 = vmatprep.subr.bf16.mxu0 %v2928_v9  ;;  %v2177_v6 = vld [vmem:[%s3539_s7 + $0x18] sm:$0xff] }
 0x24e   :  { %2776 = vmatprep.subr.bf16.mxu1 %v2929_v8 }
 0x250   :  { %2761 = vmatpush3.bf16.msra.mxu0 %v2928_v9  ;;  %v2176_v9 = vld [vmem:[%s3539_s7 + $0x10] sm:$0xff] }
 0x251   :  { %2777 = vmatpush3.bf16.msra.mxu1 %v2929_v8  ;;  %2762 = vmatprep.subr.bf16.mxu0 %v2930_v19  ;;  %v2175_v8 = vld [vmem:[%s3539_s7 + $0x8] sm:$0xff] }
 0x252   :  { %2778 = vmatprep.subr.bf16.mxu1 %v2931_v20 }
 0x254   :  { %2763 = vmatpush3.bf16.msra.mxu0 %v2930_v19 }
 0x255   :  { %2779 = vmatpush3.bf16.msra.mxu1 %v2931_v20  ;;  %2788 = vmatprep.subr.bf16.mxu0 %v2932_v36 }
 0x256   :  { %2780 = vmatprep.subr.bf16.mxu1 %v2933_v5 }
 0x257   :  { %2765 = vmatmul.mubr.bf16.vlgmr.msra.gmra.mxu0 %v2406_v40 }
 0x258   :  { %2789 = vmatpush3.bf16.msra.mxu0 %v2932_v36  ;;  %2804 = vmatprep.mubr.bf16.mxu0 %v2427_v56 }
 0x259   :  { %2781 = vmatpush3.bf16.msra.mxu1 %v2933_v5  ;;  %2790 = vmatprep.subr.bf16.mxu0 %v2934_v45 }
 0x25a   :  { %2782 = vmatprep.subr.bf16.mxu1 %v2935_v46 }
 0x25c   :  { %2791 = vmatpush3.bf16.msra.mxu0 %v2934_v45 }
 0x25d   :  { %2783 = vmatpush3.bf16.msra.mxu1 %v2935_v46  ;;  %2792 = vmatprep.subr.bf16.mxu0 %v2936_v42 }
 0x25e   :  { %2808 = vmatprep.subr.mxu1 %v3013_v0 }
 0x260   :  { %2785 = vmatmul.mubr.bf16.vlgmr.msra.gmra.mxu1 %v2416_v16  ;;  %2793 = vmatpush3.bf16.msra.mxu0 %v2936_v42 }
 0x261   :  { %2794 = vmatprep.subr.bf16.mxu0 %v2937_v7  ;;  %2809 = vmatpush3.msra.mxu1 %v2189_v59 }
 0x262   :  { %2810 = vmatprep.subr.mxu1 %v3013_v0  ;;  %2840 = vmatprep.mubr.msk.f32.mxu1 %vm3014_vm8, %v3013_v0 }
 0x263   :  { %2811 = vmatpush3.msra.mxu1 %v2188_v55 }
 0x264   :  { %2795 = vmatpush3.bf16.msra.mxu0 %v2937_v7  ;;  %2812 = vmatprep.subr.mxu1 %v3013_v0 }
 0x265   :  { %2796 = vmatprep.subr.bf16.mxu0 %v2938_v49  ;;  %2813 = vmatpush3.msra.mxu1 %v2187_v14 }
 0x266   :  { %2814 = vmatprep.subr.mxu1 %v3013_v0 }
 0x267   :  { %2815 = vmatpush3.msra.mxu1 %v2186_v63 }
 0x268   :  { %2797 = vmatpush3.bf16.msra.mxu0 %v2938_v49  ;;  %2816 = vmatprep.subr.mxu1 %v3013_v0 }
 0x269   :  { %2798 = vmatprep.subr.bf16.mxu0 %v2939_v10  ;;  %2817 = vmatpush3.msra.mxu1 %v2185_v60 }
 0x26a   :  { %2818 = vmatprep.subr.mxu1 %v3013_v0 }
 0x26b   :  { %2819 = vmatpush3.msra.mxu1 %v2184_v61 }
 0x26c   :  { %2799 = vmatpush3.bf16.msra.mxu0 %v2939_v10  ;;  %2820 = vmatprep.subr.mxu1 %v3013_v0 }
 0x26d   :  { %2800 = vmatprep.subr.bf16.mxu0 %v2940_v22  ;;  %2821 = vmatpush3.msra.mxu1 %v2183_v28 }
 0x26e   :  { %2822 = vmatprep.subr.mxu1 %v3013_v0 }
 0x26f   :  { %2823 = vmatpush3.msra.mxu1 %v2182_v25 }
 0x270   :  { %2801 = vmatpush3.bf16.msra.mxu0 %v2940_v22  ;;  %2824 = vmatprep.subr.mxu1 %v3013_v0 }
 0x271   :  { %2802 = vmatprep.subr.bf16.mxu0 %v2941_v37  ;;  %2825 = vmatpush3.msra.mxu1 %v2181_v27 }
 0x272   :  { %2826 = vmatprep.subr.mxu1 %v3013_v0 }
 0x273   :  { %2827 = vmatpush3.msra.mxu1 %v2180_v33 }
 0x274   :  { %2803 = vmatpush3.bf16.msra.mxu0 %v2941_v37  ;;  %2828 = vmatprep.subr.mxu1 %v3013_v0 }
 0x275   :  { %2829 = vmatpush3.msra.mxu1 %v2179_v3 }
 0x276   :  { %2830 = vmatprep.subr.mxu1 %v3013_v0 }
 0x277   :  { %2805 = vmatmul.mubr.bf16.vlgmr.msra.gmra.mxu0 %v2428_v58  ;;  %2831 = vmatpush3.msra.mxu1 %v2178_v51 }
 0x278   :  { %2832 = vmatprep.subr.mxu1 %v3013_v0 }
 0x279   :  { %2833 = vmatpush3.msra.mxu1 %v2177_v6 }
 0x27a   :  { %2834 = vmatprep.subr.mxu1 %v3013_v0 }
 0x27b   :  { %2835 = vmatpush3.msra.mxu1 %v2176_v9 }
 0x27c   :  { %2836 = vmatprep.subr.mxu1 %v3013_v0 }
 0x27d   :  { %2837 = vmatpush3.msra.mxu1 %v2175_v8 }
 0x27e   :  { %2838 = vmatprep.subr.mxu1 %v3013_v0 }
 0x27f   :  { %2839 = vmatpush3.msra.mxu1 %v2174_v50 }
 0x2f7   :  { %v2726_v18 = vpop.f32.mrf.mxu0 }
 0x2f8   :  { %v1527_v30 = vadd.f32 %v2726_v18, %v2382_v62 }
 0x2f9   :  { %v1518_v19 = vpop.f32.mrf.mxu0 }
 0x2fa   :  { %v1519_v13 = vadd.f32 %v2382_v62, %v1518_v19 }
 0x2fb   :  { %v2727_v21 = vpop.f32.mrf.mxu0 }
 0x2fc   :  { %v1530_v38 = vadd.f32 %v2727_v21, %v2382_v62 }
 0x2fd   :  { %v1521_v23 = vpop.f32.mrf.mxu0 }
 0x2fe   :  { %v1522_v40 = vadd.f32 %v2382_v62, %v1521_v23 }
 0x300   :  { %v2746_v20 = vpop.f32.mrf.mxu1 }
 0x301   :  { %v1705_v4 = vadd.f32 %v2746_v20, %v1527_v30  ;;  %v2437_v20 = vld [vmem:[%s3540_s8] ss:$0 sm:$0xff] }
 0x302   :  { %v1688_v29 = vpop.f32.mrf.mxu1 }
 0x303   :  { %v1703_v39 = vadd.f32 %v1688_v29, %v1519_v13 }
 0x304   :  { %v2747_v11 = vpop.f32.mrf.mxu1 }
 0x305   :  { %v1706_v43 = vadd.f32 %v2747_v11, %v1530_v38 }
 0x306   :  { %v1691_v34 = vpop.f32.mrf.mxu1 }
 0x307   :  { %v1704_v47 = vadd.f32 %v1691_v34, %v1522_v40 }
 0x317   :  { %v2766_v12 = vpop.f32.mrf.mxu0 }
 0x318   :  { %v1847_v24 = vadd.f32 %v2766_v12, %v1705_v4 }
 0x319   :  { %v1830_v35 = vpop.f32.mrf.mxu0 }
 0x31a   :  { %v1845_v45 = vadd.f32 %v1830_v35, %v1703_v39 }
 0x31b   :  { %v2767_v5 = vpop.f32.mrf.mxu0 }
 0x31c   :  { %v1848_v1 = vadd.f32 %v2767_v5, %v1706_v43 }
 0x31d   :  { %v1833_v41 = vpop.f32.mrf.mxu0 }
 0x31e   :  { %v1846_v2 = vadd.f32 %v1833_v41, %v1704_v47 }
 0x320   :  { %v2786_v36 = vpop.f32.mrf.mxu1 }
 0x321   :  { %v2003_v56 = vadd.f32 %v2786_v36, %v1847_v24 }
 0x322   :  { %v1986_v26 = vpop.f32.mrf.mxu1 }
 0x323   :  { %v2001_v15 = vadd.f32 %v1986_v26, %v1845_v45 }
 0x324   :  { %v2787_v44 = vpop.f32.mrf.mxu1 }
 0x325   :  { %v2004_v7 = vadd.f32 %v2787_v44, %v1848_v1 }
 0x326   :  { %v1989_v32 = vpop.f32.mrf.mxu1 }
 0x327   :  { %v2002_v10 = vadd.f32 %v1989_v32, %v1846_v2 }
 0x337   :  { %v2806_v46 = vpop.f32.mrf.mxu0 }
 0x338   :  { %v2143_v42 = vadd.f32 %v2806_v46, %v2003_v56 }
 0x339   :  { %v2126_v48 = vpop.f32.mrf.mxu0 }
 0x33a   :  { %v2141_v16 = vadd.f32 %v2126_v48, %v2001_v15  ;;  %v2151_v22 = vmul.f32 0.01, %v2143_v42  ;;  %vm2147_vm9 = vcmp.ge.f32.partialorder %v2143_v42, 0.0 }
 0x33b   :  { %v2807_v49 = vpop.f32.mrf.mxu0 }
 0x33c   :  { %v2144_v52 = vadd.f32 %v2807_v49, %v2004_v7  ;;  %v2149_v53 = vmul.f32 0.01, %v2141_v16  ;;  %vm2145_vm12 = vcmp.ge.f32.partialorder %v2141_v16, 0.0  ;;  %v2155_v31 = vsel %vm2147_vm9, %v2143_v42, %v2151_v22 }
 0x33d   :  { %v2129_v37 = vpop.f32.mrf.mxu0 }
 0x33e   :  { %vm2148_vm11 = vcmp.ge.f32.partialorder %v2144_v52, 0.0  ;;  %v2152_v17 = vmul.f32 0.01, %v2144_v52  ;;  %v2142_v54 = vadd.f32 %v2129_v37, %v2002_v10  ;;  %v2153_v0 = vsel %vm2145_vm12, %v2141_v16, %v2149_v53 }
 0x340   :  { %v2156_v57 = vsel %vm2148_vm11, %v2144_v52, %v2152_v17  ;;  %vm2146_vm13 = vcmp.ge.f32.partialorder %v2142_v54, 0.0  ;;  %v2150_v58 = vmul.f32 0.01, %v2142_v54 }
 0x341   :  { %v2164_v59 = vadd.f32 %v2156_v57, %v2155_v31 }
 0x342   :  { %v2154_v55 = vsel %vm2146_vm13, %v2142_v54, %v2150_v58 }
 0x343   :  { %v2165_v14 = vrot.slane %v2164_v59, 4  ;;  %v2157_v63 = vadd.f32 %v2154_v55, %v2153_v0 }
 0x345   :  { %v2166_v60 = vadd.f32 %v2165_v14, %v2164_v59  ;;  %v2158_v61 = vrot.slane %v2157_v63, 4 }
 0x347   :  { %v2167_v28 = vrot.slane %v2166_v60, 2  ;;  %v2159_v25 = vadd.f32 %v2158_v61, %v2157_v63 }
 0x349   :  { %v2168_v27 = vadd.f32 %v2167_v28, %v2166_v60  ;;  %v2160_v33 = vrot.slane %v2159_v25, 2 }
 0x34b   :  { %v2161_v3 = vadd.f32 %v2160_v33, %v2159_v25  ;;  %v2169_v51 = vrot.slane %v2168_v27, 1 }
 0x34d   :  { %v2162_v6 = vrot.slane %v2161_v3, 1  ;;  %v2170_v9 = vadd.f32 %v2169_v51, %v2168_v27 }
 0x34f   :  { %v2163_v8 = vadd.f32 %v2162_v6, %v2161_v3  ;;  %v2173_v18 = vmul.f32 0.0625, %v2170_v9 }
 0x351   :  { %v2172_v50 = vmul.f32 0.0625, %v2163_v8 }
 0x353   :  { %v2200_v19 = vsel %vm2199_vm14, %v2173_v18, %v2172_v50 }
 0x354   :  { %2841 = vmatmul.mubr.f32.vlgmr.msra.gmra.mxu1 %v2200_v19 }
 0x414   :  { %v2268_v21 = vpop.f32.mrf.mxu1 }
 0x415   :  { %v2269_v29 = vadd.f32 %v2437_v20, %v2268_v21 }
 0x416   :  { %v2842_v23 = vpop.f32.mrf.mxu1 }
 0x417   :  { %2273 = vst.msk [vmem:[#allocation8] sm:$0x3] %vm2272_vm15, %v2269_v29 }
 0x418   :  { %2993 = shalt.err (!%p2990_p0)
}
 0x419   :  { %2283 = dma.vmem_to_hbm [thread:$0]  %s2281_s26, 32, %s3541_s9, [#allocation5]  }
 0x41a   :  { %3006 = dma.done.wait [#allocation5], 32  }
 0x41b   :  { %3007 = vsyncadd [#allocation5], 4294967264 }
 0x41c   :  { %2287 = vsyncpa [#allocation4], 1 }
 0x41d   :  { %2288 = vsyncpa [#allocation7], 1 }
 0x41e   :  { %2289 = vsyncpa [#allocation5], 1 }

</bundles_post_ra>
